<compile_context>
chip_gen: v5e
topology: v5e:2x2
jax: 0.10.0
libtpu: 0.0.40
codegen_flags: <defaults>
</compile_context>

<pallas_src>
import functools

import jax
import jax.numpy as jnp
from jax import lax
from jax.experimental import pallas as pl
from jax.experimental.pallas import tpu as pltpu


def _round_up(x, m):
    return ((x + m - 1) // m) * m


def _vmem_capacity_bytes():
    try:
        return int(pltpu.get_tpu_info().vmem_capacity_bytes)
    except Exception:
        return 64 * 1024 * 1024  # conservative fallback (v7x per-core VMEM)


def _softmax_rows(z):
    m = jnp.max(z, axis=-1, keepdims=True)
    e = jnp.exp(z - m)
    return e * pl.reciprocal(jnp.sum(e, axis=-1, keepdims=True), approx=True)


def _sparsemax_rows(zc, col_chunk):
    """Exact replica of the module's sparsemax on a (rows, D) slab.

    rank/cumsum are accumulated over static, lane-aligned column slabs of width
    `col_chunk` so the O(rows*D*C) pairwise temporaries stay VMEM-bounded even
    for large D.  valid_j <=> cumsum_j > 1 (algebraic form, no per-element
    divide); tau uses a single (rows, 1) divide.
    """
    rows, d = zc.shape
    idx = lax.broadcasted_iota(jnp.int32, (rows, d), 1)
    zi = zc[:, :, None]                           # element i's value
    ii = idx[:, :, None]                          # element i's index

    def partial(off):
        zj = zc[:, off:off + col_chunk][:, None, :]      # (rows, 1, C)
        jj = idx[:, off:off + col_chunk][:, None, :]
        # before[r, i, j] == 1  <=>  element j sits at-or-before element i in
        # the descending sort order (ties broken by index; tie-invariant).
        before = jnp.where((zj > zi) | ((zj == zi) & (jj <= ii)), 1.0, 0.0)
        return jnp.sum(before, axis=-1), jnp.sum(before * zj, axis=-1)

    rank, csum = partial(0)                       # 1-based sorted pos / cumsum
    for off in range(col_chunk, d, col_chunk):    # static offsets, fully unrolled
        r2, s2 = partial(off)
        rank = rank + r2
        csum = csum + s2

    # valid_j <=> z_(j) > (1 + j*z_(j) - cumsum_j)/j  <=>  cumsum_j > 1
    valid = jnp.where(csum > 1.0, 1.0, 0.0)
    k = jnp.maximum(jnp.sum(valid, axis=-1, keepdims=True), 1.0)
    at_k = jnp.where(rank == k, 1.0, 0.0)         # one-hot: sorted position k
    z_k = jnp.sum(at_k * zc, axis=-1, keepdims=True)
    csum_k = jnp.sum(at_k * csum, axis=-1, keepdims=True)
    tau = (1.0 + k * z_k - csum_k) / k            # single (rows, 1) divide
    return jnp.maximum(zc - tau, 0.0)


def _attention_kernel(x_ref, w_ref, o_ref, *scratch, use_sparsity, row_chunk,
                      col_chunk):
    # Linear (bias=False): logits = x @ W.T, contracted directly on W's dim 1
    # (no transposed weight copy in HBM; f32 accumulation on the MXU).
    z = lax.dot_general(
        x_ref[...], w_ref[...],
        dimension_numbers=(((1,), (1,)), ((), ())),
        preferred_element_type=jnp.float32)
    bm = z.shape[0]

    if not use_sparsity:
        # Softmax temporaries are only O(bm*D): consume z directly, no scratch.
        o_ref[...] = _softmax_rows(z).astype(o_ref.dtype)
        return

    if row_chunk >= bm:
        # Single slab: no logits scratch round trip, no inner loop.
        o_ref[...] = _sparsemax_rows(z, col_chunk).astype(o_ref.dtype)
        return

    # Row-slab path (large tiles / large D): bound the pairwise temporaries by
    # looping row slabs read back from a VMEM scratch (fori_loop keeps the live
    # range of each slab's temporaries contained).
    z_ref, = scratch
    z_ref[...] = z
    n_rows = bm // row_chunk

    def body(c, carry):
        off = pl.multiple_of(c * row_chunk, row_chunk)
        zc = z_ref[pl.ds(off, row_chunk), :]
        o_ref[pl.ds(off, row_chunk), :] = (
            _sparsemax_rows(zc, col_chunk).astype(o_ref.dtype))
        return carry

    lax.fori_loop(0, n_rows, body, 0, unroll=min(n_rows, 8))


def attention_block(x, w, *, use_sparsity: bool = True, bm: int | None = None,
                    row_chunk: int | None = None, col_chunk: int | None = None):
    """x: (N, D).  w: (D, D) nn.Linear weight (out_dim, in_dim).  Returns (N, D)."""
    N, D = x.shape
    assert w.shape == (D, D)
    isz_x = jnp.dtype(x.dtype).itemsize
    isz_w = jnp.dtype(w.dtype).itemsize

    # Per-generation VMEM budget: <= 75% of physical per-core VMEM
    # (~48 MiB v7x, ~96 MiB v5e/v6e), instead of a hard 64 MiB cap.
    vmem_cap = _vmem_capacity_bytes()
    vmem_budget = vmem_cap * 3 // 4

    # --- batch tile ---------------------------------------------------------
    if bm is None:
        bm_cap = 512 if vmem_cap >= 96 * 1024 * 1024 else 256
        # >= 2 grid steps so both v7x TensorCores get work (harmless elsewhere).
        bm = min(bm_cap, _round_up(pl.cdiv(N, 2), 8))
    bm = max(8, _round_up(bm, 8))

    def fixed_bytes(b):
        # double-buffered x/out tiles + double-buffered resident weight
        return 2 * 2 * b * D * isz_x + 2 * D * D * isz_w

    while bm > 8 and fixed_bytes(bm) > vmem_budget // 2:
        bm = max(8, _round_up(bm // 2, 8))

    n_pad = _round_up(N, bm)
    if n_pad != N:
        x = jnp.pad(x, ((0, n_pad - N), (0, 0)))

    # --- sparsemax slab sizing: ~4 live (rows, D, cols) f32 temporaries ------
    def slab_bytes(r, c):
        return 4 * r * D * c * 4

    if use_sparsity:
        pair_budget = max(4 * 1024 * 1024,
                          vmem_budget - fixed_bytes(bm) - bm * D * 4)
        if row_chunk is None:
            if slab_bytes(bm, D) <= pair_budget:
                row_chunk = bm                      # single slab, no loop
            else:
                cands = [r for r in range(bm, 7, -8) if bm % r == 0]
                row_chunk = next(
                    (r for r in cands if slab_bytes(r, D) <= pair_budget), 8)
        row_chunk = min(max(8, (row_chunk // 8) * 8), bm)
        while bm % row_chunk:
            row_chunk -= 8
        if col_chunk is None:
            col_chunk = D
            if slab_bytes(row_chunk, D) > pair_budget:
                # Large-D fallback: chunk the pairwise accumulation over columns.
                max_c = max(1, pair_budget // (4 * row_chunk * D * 4))
                divisors = [c for c in range(1, D + 1)
                            if D % c == 0 and c <= max_c]
                lane_ok = [c for c in divisors if c % 128 == 0]
                col_chunk = max(lane_ok) if lane_ok else max(divisors)
        else:
            while D % col_chunk:
                col_chunk -= 1
        col_chunk = max(1, min(col_chunk, D))
    else:
        row_chunk, col_chunk = bm, D

    need_scratch = use_sparsity and row_chunk < bm
    scratch_shapes = [pltpu.VMEM((bm, D), jnp.float32)] if need_scratch else []

    # --- VMEM limit: real estimate (no 2x hedge), clamped to the 75% budget ---
    est = (fixed_bytes(bm)
           + (bm * D * 4 if need_scratch else 0)
           + (slab_bytes(row_chunk, col_chunk) if use_sparsity
              else 2 * bm * D * 4))
    vmem_limit = int(min(vmem_budget, max(32 * 1024 * 1024, int(est * 1.25))))

    kernel = functools.partial(_attention_kernel, use_sparsity=use_sparsity,
                               row_chunk=row_chunk, col_chunk=col_chunk)

    out = pl.pallas_call(
        kernel,
        out_shape=jax.ShapeDtypeStruct((n_pad, D), x.dtype),
        grid_spec=pltpu.PrefetchScalarGridSpec(
            num_scalar_prefetch=0,
            grid=(n_pad // bm,),
            in_specs=[
                pl.BlockSpec((bm, D), lambda i: (i, 0)),   # batch-tiled input
                pl.BlockSpec((D, D), lambda i: (0, 0)),    # weight, DMA'd once
            ],
            out_specs=pl.BlockSpec((bm, D), lambda i: (i, 0)),
            scratch_shapes=scratch_shapes,
        ),
        compiler_params=pltpu.CompilerParams(
            dimension_semantics=("parallel",),
            vmem_limit_bytes=vmem_limit,
        ),
    )(x, w)
    return out[:N] if n_pad != N else out


# ------------- pure-JAX reference (mirrors the PyTorch code exactly) -------------
def _sparsemax_ref(x):
    z = jnp.sort(x, axis=-1)[..., ::-1]
    cs = jnp.cumsum(z, axis=-1)
    idx = jnp.arange(1, z.shape[-1] + 1, dtype=x.dtype)
    cand = (1.0 + idx * z - cs) / idx
    valid = z > cand
    k = jnp.maximum(jnp.sum(valid.astype(jnp.int32), axis=-1, keepdims=True), 1)
    tau = jnp.take_along_axis(cand, k - 1, axis=-1)
    return jnp.maximum(x - tau, 0.0)


def _attention_block_ref(x, w, use_sparsity=True):
    logits = jnp.dot(x, w.T, precision=lax.Precision.HIGHEST)
    if use_sparsity:
        return _sparsemax_ref(logits)
    return jax.nn.softmax(logits, axis=-1)


if __name__ == "__main__":
    # Small shapes consistent with the module: batch=16, input_dim=32.
    N, D = 16, 32
    key = jax.random.PRNGKey(0)
    kx, kw, kx2, kx3, kw3 = jax.random.split(key, 5)

    x = jax.random.normal(kx, (N, D), dtype=jnp.float32)
    bound = 1.0 / (D ** 0.5)  # nn.Linear default init scale
    w = jax.random.uniform(kw, (D, D), dtype=jnp.float32, minval=-bound, maxval=bound)

    # sparsemax branch (use_sparsity=True): 2-step grid, no scratch, no loops.
    out = jax.block_until_ready(attention_block(x, w, use_sparsity=True))
    ref = _attention_block_ref(x, w, use_sparsity=True)
    assert out.shape == (N, D) and out.dtype == x.dtype
    assert jnp.allclose(out, ref, atol=1e-4, rtol=1e-4), "sparsemax mismatch"

    # softmax branch (use_sparsity=False); looser tol for approx reciprocal (~2^-12).
    out_sm = jax.block_until_ready(attention_block(x, w, use_sparsity=False))
    ref_sm = _attention_block_ref(x, w, use_sparsity=False)
    assert jnp.allclose(out_sm, ref_sm, atol=1e-3, rtol=1e-3), "softmax mismatch"

    # Padded batch / explicit multi-step grid.
    N2 = 72
    x2 = jax.random.normal(kx2, (N2, D), dtype=jnp.float32)
    out2 = jax.block_until_ready(attention_block(x2, w, use_sparsity=True, bm=40))
    ref2 = _attention_block_ref(x2, w, use_sparsity=True)
    assert jnp.allclose(out2, ref2, atol=1e-4, rtol=1e-4), "tiled/padded mismatch"

    # Exercise the row-slab + column-slab (large-D fallback) path at a small size.
    N3, D3 = 32, 256
    x3 = jax.random.normal(kx3, (N3, D3), dtype=jnp.float32)
    b3 = 1.0 / (D3 ** 0.5)
    w3 = jax.random.uniform(kw3, (D3, D3), dtype=jnp.float32, minval=-b3, maxval=b3)
    out3 = jax.block_until_ready(
        attention_block(x3, w3, use_sparsity=True, bm=32, row_chunk=8, col_chunk=128))
    ref3 = _attention_block_ref(x3, w3, use_sparsity=True)
    assert jnp.allclose(out3, ref3, atol=1e-3, rtol=1e-3), "chunked sparsemax mismatch"

    print("KERNEL_OK")
</pallas_src>

<mosaic_0001>
module attributes {stable_mosaic.version = 11 : i64} {
  func.func @_attention_kernel(%arg0: i32, %arg1: memref<8x32xf32, #tpu.memory_space<vmem>>, %arg2: memref<32x32xf32, #tpu.memory_space<vmem>>, %arg3: memref<8x32xf32, #tpu.memory_space<vmem>>) attributes {dimension_semantics = [#tpu.dimension_semantics<parallel>], iteration_bounds = array<i64: 2>, scalar_prefetch = 0 : i64, scratch_operands = 0 : i64, tpu.core_type = #tpu.core_type<tc>, window_params = [{transform_indices = @transform_0, window_bounds = array<i64: 8, 32>}, {pipeline_mode = #tpu.pipeline_mode<synchronous>, transform_indices = @transform_1, window_bounds = array<i64: 32, 32>}, {transform_indices = @transform_2, window_bounds = array<i64: 8, 32>}]} {
    %c0 = arith.constant 0 : index
    %c0_0 = arith.constant 0 : index
    %0 = vector.load %arg1[%c0, %c0_0] : memref<8x32xf32, #tpu.memory_space<vmem>>, vector<8x32xf32>
    %c0_1 = arith.constant 0 : index
    %c0_2 = arith.constant 0 : index
    %1 = vector.load %arg2[%c0_1, %c0_2] : memref<32x32xf32, #tpu.memory_space<vmem>>, vector<32x32xf32>
    %cst = arith.constant dense<0.000000e+00> : vector<8x32xf32>
    %2 = tpu.matmul %0, %1, %cst {dimension_numbers = #tpu.dot_dimension_numbers<[1], [1], [0], [0], [0, 0, 1, 0], [], []>} : vector<8x32xf32>, vector<32x32xf32>, vector<8x32xf32> -> vector<8x32xf32>
    %3 = tpu.iota {dimensions = array<i32: 1>} : vector<8x32xi32>
    %4 = vector.shape_cast %2 : vector<8x32xf32> to vector<8x32x1xf32>
    %5 = vector.shape_cast %3 : vector<8x32xi32> to vector<8x32x1xi32>
    %6 = vector.shape_cast %2 : vector<8x32xf32> to vector<8x1x32xf32>
    %7 = vector.shape_cast %3 : vector<8x32xi32> to vector<8x1x32xi32>
    %8 = vector.broadcast %6 : vector<8x1x32xf32> to vector<8x32x32xf32>
    %9 = vector.broadcast %4 : vector<8x32x1xf32> to vector<8x32x32xf32>
    %10 = arith.cmpf ogt, %8, %9 : vector<8x32x32xf32>
    %11 = vector.broadcast %6 : vector<8x1x32xf32> to vector<8x32x32xf32>
    %12 = vector.broadcast %4 : vector<8x32x1xf32> to vector<8x32x32xf32>
    %13 = arith.cmpf oeq, %11, %12 : vector<8x32x32xf32>
    %14 = vector.broadcast %7 : vector<8x1x32xi32> to vector<8x32x32xi32>
    %15 = vector.broadcast %5 : vector<8x32x1xi32> to vector<8x32x32xi32>
    %16 = arith.cmpi sle, %14, %15 : vector<8x32x32xi32>
    %17 = arith.andi %13, %16 : vector<8x32x32xi1>
    %18 = arith.ori %10, %17 : vector<8x32x32xi1>
    %cst_3 = arith.constant 1.000000e+00 : f32
    %cst_4 = arith.constant 0.000000e+00 : f32
    %19 = vector.broadcast %cst_3 : f32 to vector<8x32x32xf32>
    %20 = vector.broadcast %cst_4 : f32 to vector<8x32x32xf32>
    %21 = arith.select %18, %19, %20 : vector<8x32x32xi1>, vector<8x32x32xf32>
    %cst_5 = arith.constant dense<0.000000e+00> : vector<8x32xf32>
    %22 = vector.multi_reduction <add>, %21, %cst_5 [2] : vector<8x32x32xf32> to vector<8x32xf32>
    %23 = vector.broadcast %6 : vector<8x1x32xf32> to vector<8x32x32xf32>
    %24 = arith.mulf %21, %23 : vector<8x32x32xf32>
    %cst_6 = arith.constant dense<0.000000e+00> : vector<8x32xf32>
    %25 = vector.multi_reduction <add>, %24, %cst_6 [2] : vector<8x32x32xf32> to vector<8x32xf32>
    %cst_7 = arith.constant 1.000000e+00 : f32
    %26 = vector.broadcast %cst_7 : f32 to vector<8x32xf32>
    %27 = arith.cmpf ogt, %25, %26 : vector<8x32xf32>
    %cst_8 = arith.constant 1.000000e+00 : f32
    %cst_9 = arith.constant 0.000000e+00 : f32
    %28 = vector.broadcast %cst_8 : f32 to vector<8x32xf32>
    %29 = vector.broadcast %cst_9 : f32 to vector<8x32xf32>
    %30 = arith.select %27, %28, %29 : vector<8x32xi1>, vector<8x32xf32>
    %cst_10 = arith.constant dense<0.000000e+00> : vector<8xf32>
    %31 = vector.multi_reduction <add>, %30, %cst_10 [1] : vector<8x32xf32> to vector<8xf32>
    %32 = vector.shape_cast %31 : vector<8xf32> to vector<8x1xf32>
    %cst_11 = arith.constant 1.000000e+00 : f32
    %33 = vector.broadcast %cst_11 : f32 to vector<8x1xf32>
    %34 = arith.maximumf %32, %33 : vector<8x1xf32>
    %35 = vector.broadcast %34 : vector<8x1xf32> to vector<8x32xf32>
    %36 = arith.cmpf oeq, %22, %35 : vector<8x32xf32>
    %cst_12 = arith.constant 1.000000e+00 : f32
    %cst_13 = arith.constant 0.000000e+00 : f32
    %37 = vector.broadcast %cst_12 : f32 to vector<8x32xf32>
    %38 = vector.broadcast %cst_13 : f32 to vector<8x32xf32>
    %39 = arith.select %36, %37, %38 : vector<8x32xi1>, vector<8x32xf32>
    %40 = arith.mulf %39, %2 : vector<8x32xf32>
    %cst_14 = arith.constant dense<0.000000e+00> : vector<8xf32>
    %41 = vector.multi_reduction <add>, %40, %cst_14 [1] : vector<8x32xf32> to vector<8xf32>
    %42 = vector.shape_cast %41 : vector<8xf32> to vector<8x1xf32>
    %43 = arith.mulf %39, %25 : vector<8x32xf32>
    %cst_15 = arith.constant dense<0.000000e+00> : vector<8xf32>
    %44 = vector.multi_reduction <add>, %43, %cst_15 [1] : vector<8x32xf32> to vector<8xf32>
    %45 = vector.shape_cast %44 : vector<8xf32> to vector<8x1xf32>
    %46 = arith.mulf %34, %42 : vector<8x1xf32>
    %cst_16 = arith.constant 1.000000e+00 : f32
    %47 = vector.broadcast %cst_16 : f32 to vector<8x1xf32>
    %48 = arith.addf %47, %46 : vector<8x1xf32>
    %49 = arith.subf %48, %45 : vector<8x1xf32>
    %50 = arith.divf %49, %34 : vector<8x1xf32>
    %51 = vector.broadcast %50 : vector<8x1xf32> to vector<8x32xf32>
    %52 = arith.subf %2, %51 : vector<8x32xf32>
    %cst_17 = arith.constant 0.000000e+00 : f32
    %53 = vector.broadcast %cst_17 : f32 to vector<8x32xf32>
    %54 = arith.maximumf %52, %53 : vector<8x32xf32>
    %c0_18 = arith.constant 0 : index
    %c0_19 = arith.constant 0 : index
    %55 = vector.load %arg3[%c0_18, %c0_19] : memref<8x32xf32, #tpu.memory_space<vmem>>, vector<8x32xf32>
    tpu.vector_store %arg3[%c0_18, %c0_19], %54 {strides = array<i32>} : memref<8x32xf32, #tpu.memory_space<vmem>>, vector<8x32xf32>,
    return
  }
  func.func @transform_0(%arg0: i32) -> (i32, i32) {
    %c0_i32 = arith.constant 0 : i32
    %c0_i32_0 = arith.constant 0 : i32
    return %arg0, %c0_i32 : i32, i32
  }
  func.func @transform_1(%arg0: i32) -> (i32, i32) {
    %c0_i32 = arith.constant 0 : i32
    %c0_i32_0 = arith.constant 0 : i32
    %c0_i32_1 = arith.constant 0 : i32
    return %c0_i32, %c0_i32_0 : i32, i32
  }
  func.func @transform_2(%arg0: i32) -> (i32, i32) {
    %c0_i32 = arith.constant 0 : i32
    %c0_i32_0 = arith.constant 0 : i32
    return %arg0, %c0_i32 : i32, i32
  }
}

</mosaic_0001>

<bundles_post_ra>
// kernel: tpu_custom_call.1
= control target key start
LH: loop header
LB: loop body
LE: loop exit
PB: predicated region body
PF: predicated region fallthrough
CT: control target
= control target key end

     0   :  { %7 = vsyncpa [#allocation3], 0  ;;  %s3750_s0 = inlined_call_operand.hbm [shape: f32[16,32], index: 0, kind: input, shape index: {}]   ;;  %s3751_s1 = inlined_call_operand.hbm [shape: f32[32,32], index: 1, kind: input, shape index: {}]   ;;  %s3752_s2 = inlined_call_operand.hbm [shape: f32[16,32], index: 2, kind: output, shape index: {}]  }
   0x1   :  { %9 = vsyncpa [#allocation3 + $0x1], 0 }
   0x2   :  { %10 = vsyncpa [#allocation6], 0 }
   0x3   :  { %11 = vsyncpa [#allocation4], 0 }
   0x4   :  { %13 = vsyncpa [#allocation4 + $0x1], 0  ;;  %s2260_s9 = smov 0   ;;  %s2262_s10 = smov 0  }
   0x5   :  { %s2264_s11 = smov 0   ;;  %s2266_s12 = smov 0  }
   0x6 LB: > { %s108_s15 = sshll.u32 %s3751_s1, 4  ;;  %s2284_s16 = sadd.s32 4294967295, %s2238_s12   ;;  %s2238_s12 = sphi %s2266_s12, %s3876_s12   ;;  %s2234_s11 = sphi %s2264_s11, %s3875_s11   ;;  %s2230_s10 = sphi %s2262_s10, %s3874_s10   ;;  %s2226_s9 = sphi %s2260_s9, %s3873_s9   ;;  %s109_s15 = int_to_ptr.hbm [resolvable:$true] %s108_s15 }
   0x7   : > { %p1961_p0 = scmp.ge.s32.totalorder %s2238_s12, 1  ;;  %p40_p1 = scmp.eq.s32.totalorder %s2284_s16, 0 }
   0x8   : > { %p97_p2 = scmp.lt.s32.totalorder %s2238_s12, 3  ;;  %s2240_s18 = smov [#allocation5]  }
   0x9   : > { %s110_s19 = sshll.u32 %s2240_s18, 4  ;;  %s2241_s20 = smov 128   ;;  %s111_s19 = int_to_ptr.vmem [resolvable:$true] %s110_s19 }
   0xa   : > { %p2289_p3 = pnand %p1961_p0, %p97_p2  ;;  %s2242_s21 = smov 8  }
   0xb   : > { %s1960_s22 = sadd.s32 4294967294, %s2238_s12   ;;  %s2300_s23 = sadd.s32 1, %s2238_s12  }
   0xc   : > { %p1987_p4 = pneg %p2289_p3  ;;  %s26_s24 = sadd.s32 1, %s2234_s11 }
   0xd   : > { %s23_s25 = ssub.s32 %s2238_s12, %s2300_s23  ;;  %p33_p7 = scmp.ne.s32.totalorder %s2234_s11, %s2230_s10 }
   0xe   : > { %p1988_p6 = pnand %p1987_p4, %p40_p1  ;;  %p24_p8 = scmp.eq.s32.totalorder %s23_s25, 0 }
   0xf   : > { %p34_p9 = scmp.eq.s32.totalorder %s2238_s12, 0  ;;  %p39_p10 = scmp.ne.s32.totalorder %s2230_s10, %s2226_s9 }
  0x10   : > { %1990 = dma.hbm_to_vmem [thread:$0]  (!%p1988_p6), %s109_s15, 512, %s111_s19, [#allocation6], %s2241_s20, %s2241_s20, %s2242_s21  }
  0x11   : > { %p84_p11 = scmp.eq.s32.totalorder %s2284_s16, 1  ;;  %p2316_p12 = por %p40_p1, %p39_p10 }
  0x12   : > { %s2312_s26 = scalar_select %p24_p8, %s2234_s11, %s26_s24  }
  0x13   : > { %p2320_p13 = por %p84_p11, %p33_p7  ;;  %p90_p0 = scmp.eq.s32.totalorder %s1960_s22, 1 }
  0x14   : > { %p35_p2 = por %p34_p9, %p33_p7  ;;  %s124_s29 = sand.u32 1, %s2234_s11  }
  0x15   : > { %p2325_p4 = por %p90_p0, %p39_p10  ;;  %p2000_p6 = scmp.lt.s32.totalorder %s2238_s12, 2 }
  0x16   : > { %s1964_s3 = sshll.u32 %s124_s29, 3  ;;  %s1965_s4 = sshll.u32 %s2238_s12, 3 }
  0x17   : > { %s132_s7 = scalar_lea.hbm %s3750_s0, %s1965_s4  ;;  %s128_s13 = scalar_lea.vmem [#allocation2], %s1964_s3 }
  0x18   : > { %s134_s8 = sshll.u32 %s132_s7, 4  ;;  %s136_s14 = sshll.u32 %s128_s13, 4  ;;  %s135_s8 = int_to_ptr.hbm [resolvable:$true] %s134_s8  ;;  %s137_s14 = int_to_ptr.vmem [resolvable:$true] %s136_s14 }
  0x19   : > { %p2334_p8 = pnand %p2000_p6, %p35_p2  ;;  %s125_s18 = scalar_lea.sflag [#allocation3], %s124_s29 }
  0x1a   : > { %s2138_s19 = sshra.s32 %s135_s8, 4  ;;  %s2145_s24 = scalar_lea.hbm %s3750_s0, 16  ;;  %s2139_s19 = int_to_ptr.hbm [resolvable:$true] %s2138_s19 }
  0x1b   : > { %s2140_s20 = scalar_lea.hbm %s2139_s19, 8  ;;  %p2142_p9 = pneg %p2334_p8 }
  0x1c   : > { %p2141_p7 = scmp.ne.s32.totalorder %s2139_s19, %s2140_s20  ;;  %p2146_p0 = scmp.lt.s32.totalorder %s2139_s19, %s3750_s0 }
  0x1d   : > { %p2147_p2 = scmp.lt.s32.totalorder %s2145_s24, %s2140_s20 }
  0x1e   : > { %p2143_p10 = pnand %p2142_p9, %p2141_p7 }
  0x1f   : > { %p2148_p6 = por %p2147_p2, %p2146_p0 }
  0x20   : > { %p2144_p11 = pneg %p2143_p10 }
  0x22   : > { %p2149_p5 = pnand %p2148_p6, %p2144_p11 }
  0x24   : > { %2152 = shalt.err (!%p2149_p5)
}
  0x25   : > { %1994 = dma.hbm_to_vmem [thread:$0]  (!%p2334_p8), %s135_s8, 128, %s137_s14, %s125_s18  }
  0x26   : > { %145 = sbr.rel (%p2289_p3) target bundleno = 1381 (0x565), region = 28 }
  0x2b   : > { %s2351_s29 = sand.u32 1, %s2230_s10  }
  0x2c   : > { %s1967_s4 = sshll.u32 %s2351_s29, 3  ;;  %s148_s5 = scalar_lea.sflag [#allocation3], %s2351_s29 }
  0x2d   : > { %s151_s6 = scalar_lea.vmem [#allocation2], %s1967_s4 }
  0x2e   : > { %2213 = dma.done.wait (%p2316_p12), %s148_s5, 128  }
  0x2f   : > { %2215 = vsyncadd (%p2316_p12), %s148_s5, 4294967168 }
  0x30   : > { %2217 = dma.done.wait (%p40_p1), [#allocation6], 512  }
  0x31   : > { %2219 = vsyncadd (%p40_p1), [#allocation6], 4294966784  ;;  %v219_v0 = vlaneseq  ;;  %vm183_vm0 = vcmask 261120   ;;  %v182_v4 = vld [vmem:[#allocation5 + $0x18] sm:$0xff]  ;;  %v181_v6 = vld [vmem:[#allocation5 + $0x10] sm:$0xff]  ;;  %v3753_v26 = vmov 0.0  }
  0x32   : > { %1970 = vmatpush.xpose.msk.msra.mxu0 %vm183_vm0, %v182_v4  ;;  %v180_v7 = vld [vmem:[#allocation5 + $0x8] sm:$0xff]  ;;  %v179_v9 = vld [vmem:[#allocation5] sm:$0xff]  ;;  %v178_v10 = vld [vmem:[%s151_s6] sm:$0xff]  ;;  %s1976_s17 = sshll.u32 %s2284_s16, 3  ;;  %s177_s13 = scalar_lea.vmem [#allocation7], %s1967_s4 }
  0x33   : > { %v2365_v1 = vshrl.u32 %v219_v0, 7  ;;  %v2377_v5 = vand.u32 127, %v219_v0  ;;  %s1875_s8 = scalar_lea.hbm %s3752_s2, %s1976_s17  ;;  %s1877_s14 = sshll.u32 %s177_s13, 4  ;;  %s1878_s14 = int_to_ptr.vmem [resolvable:$true] %s1877_s14 }
  0x34   : > { %s1879_s15 = sshll.u32 %s1875_s8, 4  ;;  %s1865_s16 = scalar_lea.sflag [#allocation4], %s2351_s29  ;;  %s1880_s15 = int_to_ptr.hbm [resolvable:$true] %s1879_s15 }
  0x35   : > { %2040 = vset.pattern.permute.xlu2 %v2365_v1  ;;  %v2369_v2 = vadd.s32 8, %v2365_v1  ;;  %v2372_v3 = vadd.s32 16, %v2365_v1  ;;  %v2385_v8 = vadd.s32 24, %v2365_v1  ;;  %v453_v20 = vrot.slane %v2377_v5, 1  ;;  %s2182_s18 = sshra.s32 %s1880_s15, 4  ;;  %s2188_s22 = scalar_lea.hbm %s3752_s2, 16  ;;  %s2183_s18 = int_to_ptr.hbm [resolvable:$true] %s2182_s18 }
  0x36   : > { %1971 = vmatpush.xpose.msk.msra.mxu0 %vm183_vm0, %v181_v6  ;;  %v2499_v35 = vperm.slane %v2377_v5, 0  ;;  %v454_v40 = vrot.slane %v2377_v5, 2  ;;  %v455_v57 = vrot.slane %v2377_v5, 3  ;;  %s2184_s19 = scalar_lea.hbm %s2183_s18, 8  ;;  %p2189_p12 = scmp.lt.s32.totalorder %s2183_s18, %s3752_s2 }
  0x37   : > { %2041 = vset.pattern.permute.xlu0 %v2369_v2  ;;  %2042 = vset.pattern.permute.xlu1 %v2372_v3  ;;  %v2452_v22 = vperm.slane %v453_v20, 0  ;;  %p2185_p1 = scmp.ne.s32.totalorder %s2183_s18, %s2184_s19  ;;  %p2190_p8 = scmp.lt.s32.totalorder %s2188_s22, %s2184_s19 }
  0x38   : > { %v2528_v44 = vperm.slane %v454_v40, 0  ;;  %v2579_v62 = vperm.slane %v455_v57, 0 }
  0x39   : > { %p2186_p3 = pnand %p2185_p1, %p2320_p13  ;;  %p2191_p7 = por %p2190_p8, %p2189_p12 }
  0x3a   : > { %1972 = vmatpush.xpose.msk.msra.mxu0 %vm183_vm0, %v180_v7 }
  0x3b   : > { %p2187_p5 = pneg %p2186_p3 }
  0x3d   : > { %425 = vperm.xlu2 %2040, %v2377_v5   ;;  %p2192_p9 = pnand %p2191_p7, %p2187_p5 }
  0x3e   : > { %1973 = vmatpush.xpose.msk.msra.mxu0 %vm183_vm0, %v179_v9 }
  0x3f   : > { %431 = vperm.xlu0 %2041, %v2377_v5   ;;  %437 = vperm.xlu1 %2042, %v2377_v5  }
  0x41   : > { %1974 = vmatmul.msk.f32.vlgmr.msra.gmra.mxu0 %vm183_vm0, %v178_v10 }
  0x45   : > { %2043 = vset.pattern.permute.xlu2 %v2385_v8 }
  0x47   : > { %2044 = vset.pattern.permute.xlu0 %v2365_v1 }
  0x4d   : > { %443 = vperm.xlu2 %2043, %v2377_v5  }
  0x55   : > { %2047 = vset.pattern.permute.xlu2 %v2365_v1 }
  0x97   : > { %v2439_v17 = vpop.permute.xlu2 %425 }
  0x98   : > { %vm552_vm1 = vcmp.le.s32.totalorder %v2452_v22, %v2439_v17 }
  0xa7   : > { %v2448_v19 = vpop.permute.xlu2 %443 }
  0xa8   : > { %vm555_vm11 = vcmp.le.s32.totalorder %v2452_v22, %v2448_v19 }
  0xb1   : > { %v2477_v29 = vpop.permute.xlu0 %431  ;;  %v2485_v31 = vpop.permute.xlu1 %437 }
  0xb2   : > { %vm553_vm6 = vcmp.le.s32.totalorder %v2452_v22, %v2477_v29 }
  0xbe   : > { %v2393_v11 = vpop.f32.mrf.mxu0 }
  0xbf   : > { %3789 = vst [vmem:[#allocation11_spill] sm:$0xff] %v2393_v11  ;;  %v2396_v12 = vperm.slane %v2393_v11, 0  ;;  %v2399_v13 = vperm.slane %v2393_v11, 1  ;;  %v2414_v14 = vperm.slane %v2393_v11, 2  ;;  %v2423_v15 = vperm.slane %v2393_v11, 3 }
  0xc0   : > { %v2432_v16 = vperm.slane %v2393_v11, 4  ;;  %v2443_v18 = vperm.slane %v2393_v11, 5  ;;  %v446_v21 = vrot.slane %v2393_v11, 1  ;;  %v2464_v25 = vperm.slane %v2393_v11, 7 }
  0xc1   : > { %238 = vperm.xlu1 %2042, %v2396_v12   ;;  %226 = vperm.xlu0 %2044, %v2396_v12   ;;  %v447_v42 = vrot.slane %v2393_v11, 2  ;;  %v2542_v49 = vperm.slane %v2393_v11, 6  ;;  %v448_v55 = vrot.slane %v2393_v11, 3 }
  0xc2   : > { %251 = vperm.xlu2 %2047, %v2399_v13   ;;  %v2457_v23 = vperm.slane %v446_v21, 0 }
  0xc3   : > { %v2535_v47 = vperm.slane %v447_v42, 0  ;;  %v2577_v61 = vperm.slane %v448_v55, 0 }
  0xc9   : > { %2046 = vset.pattern.permute.xlu1 %v2385_v8  ;;  %2045 = vset.pattern.permute.xlu0 %v2369_v2 }
  0xca   : > { %2048 = vset.pattern.permute.xlu2 %v2369_v2 }
  0xd1   : > { %244 = vperm.xlu1 %2046, %v2396_v12   ;;  %232 = vperm.xlu0 %2045, %v2396_v12  }
  0xd2   : > { %257 = vperm.xlu2 %2048, %v2399_v13  }
  0xd9   : > { %2049 = vset.pattern.permute.xlu1 %v2372_v3  ;;  %2051 = vset.pattern.permute.xlu0 %v2365_v1 }
  0xda   : > { %2050 = vset.pattern.permute.xlu2 %v2385_v8 }
  0xe1   : > { %263 = vperm.xlu1 %2049, %v2399_v13   ;;  %276 = vperm.xlu0 %2051, %v2414_v14  }
  0xe2   : > { %269 = vperm.xlu2 %2050, %v2399_v13  }
  0xe9   : > { %2052 = vset.pattern.permute.xlu1 %v2369_v2  ;;  %2056 = vset.pattern.permute.xlu0 %v2369_v2 }
  0xea   : > { %2053 = vset.pattern.permute.xlu2 %v2372_v3 }
  0xf1   : > { %282 = vperm.xlu1 %2052, %v2414_v14   ;;  %307 = vperm.xlu0 %2056, %v2423_v15  }
  0xf2   : > { %288 = vperm.xlu2 %2053, %v2414_v14  }
  0xf9   : > { %2054 = vset.pattern.permute.xlu1 %v2385_v8  ;;  %2061 = vset.pattern.permute.xlu0 %v2372_v3 }
  0xfa   : > { %2055 = vset.pattern.permute.xlu2 %v2365_v1 }
 0x101   : > { %294 = vperm.xlu1 %2054, %v2414_v14   ;;  %338 = vperm.xlu0 %2061, %v2432_v16  }
 0x102   : > { %301 = vperm.xlu2 %2055, %v2423_v15  }
 0x109   : > { %2057 = vset.pattern.permute.xlu1 %v2372_v3  ;;  %2066 = vset.pattern.permute.xlu0 %v2385_v8 }
 0x10a   : > { %2058 = vset.pattern.permute.xlu2 %v2385_v8 }
 0x111   : > { %313 = vperm.xlu1 %2057, %v2423_v15   ;;  %369 = vperm.xlu0 %2066, %v2443_v18  }
 0x112   : > { %319 = vperm.xlu2 %2058, %v2423_v15  }
 0x119   : > { %2059 = vset.pattern.permute.xlu1 %v2365_v1  ;;  %2071 = vset.pattern.permute.xlu0 %v2365_v1 }
 0x11a   : > { %2060 = vset.pattern.permute.xlu2 %v2369_v2 }
 0x11c   : > { %v252_v24 = vpop.permute.xlu2 %251 }
 0x11d   : > { %vm512_vm2 = vcmp.eq.f32.partialorder %v2457_v23, %v252_v24  ;;  %vm480_vm3 = vcmp.gt.f32.partialorder %v2457_v23, %v252_v24 }
 0x11e   : > { %vm584_vm4 = vmand %vm512_vm2, %vm552_vm1  ;;  %vm550_vm1 = vcmp.le.s32.totalorder %v2499_v35, %v2485_v31 }
 0x11f   : > { %vm616_vm5 = vmor %vm480_vm3, %vm584_vm4 }
 0x120   : > { %v2469_v27 = vsel %vm616_vm5, 1.0, %v3753_v26 }
 0x121   : > { %326 = vperm.xlu1 %2059, %v2432_v16   ;;  %401 = vperm.xlu0 %2071, %v2464_v25   ;;  %v2473_v28 = vmul.f32 %v2469_v27, %v2457_v23 }
 0x122   : > { %332 = vperm.xlu2 %2060, %v2432_v16  }
 0x129   : > { %2062 = vset.pattern.permute.xlu1 %v2385_v8  ;;  %2076 = vset.pattern.permute.xlu0 %v2369_v2 }
 0x12a   : > { %2063 = vset.pattern.permute.xlu2 %v2365_v1 }
 0x12c   : > { %v258_v30 = vpop.permute.xlu2 %257 }
 0x12d   : > { %vm513_vm7 = vcmp.eq.f32.partialorder %v2457_v23, %v258_v30  ;;  %vm481_vm8 = vcmp.gt.f32.partialorder %v2457_v23, %v258_v30  ;;  %v449_v30 = vrot.slane %v2393_v11, 4 }
 0x12e   : > { %vm585_vm9 = vmand %vm513_vm7, %vm553_vm6 }
 0x12f   : > { %vm617_vm10 = vmor %vm481_vm8, %vm585_vm9  ;;  %vm558_vm8 = vcmp.le.s32.totalorder %v2528_v44, %v2485_v31  ;;  %v2624_v42 = vperm.slane %v449_v30, 0 }
 0x130   : > { %v2489_v32 = vsel %vm617_vm10, 1.0, %v3753_v26 }
 0x131   : > { %344 = vperm.xlu1 %2062, %v2432_v16   ;;  %v2493_v33 = vmul.f32 %v2489_v32, %v2457_v23 }
 0x132   : > { %351 = vperm.xlu2 %2063, %v2443_v18  }
 0x133   : > { %v239_v34 = vpop.permute.xlu1 %238  ;;  %v2517_v39 = vpop.permute.xlu0 %226 }
 0x134   : > { %vm510_vm12 = vcmp.eq.f32.partialorder %v2396_v12, %v239_v34  ;;  %vm478_vm3 = vcmp.gt.f32.partialorder %v2396_v12, %v239_v34 }
 0x135   : > { %vm582_vm4 = vmand %vm510_vm12, %vm550_vm1 }
 0x136   : > { %vm614_vm5 = vmor %vm478_vm3, %vm582_vm4  ;;  %vm556_vm3 = vcmp.le.s32.totalorder %v2528_v44, %v2439_v17 }
 0x137   : > { %v2522_v41 = vsel %vm614_vm5, 1.0, %v3753_v26 }
 0x138   : > { %v682_v43 = vsel %vm183_vm0, %v2522_v41, 0.0 }
 0x139   : > { %2064 = vset.pattern.permute.xlu1 %v2369_v2 }
 0x13a   : > { %2065 = vset.pattern.permute.xlu2 %v2372_v3 }
 0x13c   : > { %v270_v36 = vpop.permute.xlu2 %269 }
 0x13d   : > { %vm515_vm13 = vcmp.eq.f32.partialorder %v2457_v23, %v270_v36  ;;  %vm483_vm14 = vcmp.gt.f32.partialorder %v2457_v23, %v270_v36 }
 0x13e   : > { %vm587_vm15 = vmand %vm515_vm13, %vm555_vm11 }
 0x13f   : > { %vm619_vm2 = vmor %vm483_vm14, %vm587_vm15  ;;  %vm554_vm14 = vcmp.le.s32.totalorder %v2452_v22, %v2485_v31 }
 0x140   : > { %v2511_v37 = vsel %vm619_vm2, 1.0, %v3753_v26 }
 0x141   : > { %357 = vperm.xlu1 %2064, %v2443_v18   ;;  %v2515_v38 = vmul.f32 %v2511_v37, %v2457_v23 }
 0x142   : > { %363 = vperm.xlu2 %2065, %v2443_v18  }
 0x143   : > { %v2530_v45 = vpop.permute.xlu1 %244  ;;  %v2532_v46 = vpop.permute.xlu0 %232 }
 0x149   : > { %2067 = vset.pattern.permute.xlu1 %v2365_v1 }
 0x14a   : > { %2068 = vset.pattern.permute.xlu2 %v2369_v2 }
 0x14b   : > { %683 = vadd.xlane.f32.xlu0 %v682_v43 }
 0x14c   : > { %v289_v48 = vpop.permute.xlu2 %288 }
 0x14d   : > { %vm518_vm6 = vcmp.eq.f32.partialorder %v2535_v47, %v289_v48  ;;  %vm486_vm7 = vcmp.gt.f32.partialorder %v2535_v47, %v289_v48 }
 0x14e   : > { %vm590_vm9 = vmand %vm518_vm6, %vm558_vm8  ;;  %vm560_vm8 = vcmp.le.s32.totalorder %v2579_v62, %v2439_v17 }
 0x14f   : > { %vm622_vm10 = vmor %vm486_vm7, %vm590_vm9 }
 0x150   : > { %v2546_v50 = vsel %vm622_vm10, 1.0, %v3753_v26 }
 0x151   : > { %376 = vperm.xlu1 %2067, %v2542_v49   ;;  %v2550_v51 = vmul.f32 %v2546_v50, %v2535_v47 }
 0x152   : > { %382 = vperm.xlu2 %2068, %v2542_v49  }
 0x153   : > { %v264_v52 = vpop.permute.xlu1 %263  ;;  %v277_v53 = vpop.permute.xlu0 %276 }
 0x154   : > { %vm514_vm11 = vcmp.eq.f32.partialorder %v2457_v23, %v264_v52  ;;  %vm516_vm12 = vcmp.eq.f32.partialorder %v2535_v47, %v277_v53  ;;  %vm482_vm13 = vcmp.gt.f32.partialorder %v2457_v23, %v264_v52  ;;  %vm484_vm1 = vcmp.gt.f32.partialorder %v2535_v47, %v277_v53 }
 0x155   : > { %vm586_vm15 = vmand %vm514_vm11, %vm554_vm14  ;;  %vm557_vm11 = vcmp.le.s32.totalorder %v2528_v44, %v2477_v29 }
 0x156   : > { %vm618_vm2 = vmor %vm482_vm13, %vm586_vm15  ;;  %vm561_vm15 = vcmp.le.s32.totalorder %v2579_v62, %v2477_v29 }
 0x157   : > { %v650_v54 = vsel %vm618_vm2, 1.0, %v3753_v26  ;;  %vm588_vm4 = vmand %vm516_vm12, %vm556_vm3 }
 0x158   : > { %v694_v56 = vsel %vm183_vm0, %v650_v54, 0.0  ;;  %vm620_vm5 = vmor %vm484_vm1, %vm588_vm4  ;;  %v2566_v58 = vmul.f32 %v650_v54, %v2457_v23  ;;  %v456_v23 = vrot.slane %v2377_v5, 4 }
 0x159   : > { %2069 = vset.pattern.permute.xlu1 %v2372_v3  ;;  %695 = vadd.xlane.f32.xlu0 %v694_v56  ;;  %v2570_v59 = vsel %vm620_vm5, 1.0, %v3753_v26 }
 0x15a   : > { %v2574_v60 = vmul.f32 %v2570_v59, %v2535_v47  ;;  %2070 = vset.pattern.permute.xlu2 %v2385_v8  ;;  %v2620_v36 = vperm.slane %v456_v23, 0 }
 0x15c   : > { %v302_v63 = vpop.permute.xlu2 %301 }
 0x15d   : > { %vm520_vm6 = vcmp.eq.f32.partialorder %v2577_v61, %v302_v63  ;;  %vm488_vm7 = vcmp.gt.f32.partialorder %v2577_v61, %v302_v63  ;;  %v450_v63 = vrot.slane %v2393_v11, 5 }
 0x15e   : > { %vm592_vm9 = vmand %vm520_vm6, %vm560_vm8  ;;  %vm563_vm8 = vcmp.le.s32.totalorder %v2579_v62, %v2448_v19 }
 0x15f   : > { %vm624_vm10 = vmor %vm488_vm7, %vm592_vm9 }
 0x160   : > { %v656_v0 = vsel %vm624_vm10, 1.0, %v3753_v26 }
 0x161   : > { %388 = vperm.xlu1 %2069, %v2542_v49   ;;  %v2590_v4 = vmul.f32 %v656_v0, %v2577_v61  ;;  %v712_v34 = vsel %vm183_vm0, %v656_v0, 0.0  ;;  %v457_v0 = vrot.slane %v2377_v5, 5 }
 0x162   : > { %394 = vperm.xlu2 %2070, %v2542_v49  }
 0x163   : > { %v283_v6 = vpop.permute.xlu1 %282  ;;  %v308_v7 = vpop.permute.xlu0 %307 }
 0x164   : > { %vm517_vm12 = vcmp.eq.f32.partialorder %v2535_v47, %v283_v6  ;;  %vm521_vm13 = vcmp.eq.f32.partialorder %v2577_v61, %v308_v7  ;;  %vm485_vm14 = vcmp.gt.f32.partialorder %v2535_v47, %v283_v6  ;;  %vm489_vm2 = vcmp.gt.f32.partialorder %v2577_v61, %v308_v7 }
 0x165   : > { %vm589_vm1 = vmand %vm517_vm12, %vm557_vm11  ;;  %v2663_v7 = vperm.slane %v450_v63, 0 }
 0x166   : > { %vm621_vm3 = vmor %vm485_vm14, %vm589_vm1  ;;  %vm566_vm14 = vcmp.le.s32.totalorder %v2620_v36, %v2485_v31 }
 0x167   : > { %v653_v9 = vsel %vm621_vm3, 1.0, %v3753_v26  ;;  %vm593_vm4 = vmand %vm521_vm13, %vm561_vm15  ;;  %vm559_vm3 = vcmp.le.s32.totalorder %v2528_v44, %v2448_v19 }
 0x168   : > { %v703_v10 = vsel %vm183_vm0, %v653_v9, 0.0  ;;  %vm625_vm5 = vmor %vm489_vm2, %vm593_vm4  ;;  %v2602_v20 = vmul.f32 %v653_v9, %v2535_v47 }
 0x169   : > { %2072 = vset.pattern.permute.xlu1 %v2369_v2  ;;  %704 = vadd.xlane.f32.xlu0 %v703_v10  ;;  %v2606_v21 = vsel %vm625_vm5, 1.0, %v3753_v26 }
 0x16a   : > { %v2610_v22 = vmul.f32 %v2606_v21, %v2577_v61  ;;  %2073 = vset.pattern.permute.xlu2 %v2372_v3 }
 0x16c   : > { %v320_v24 = vpop.permute.xlu2 %319 }
 0x16d   : > { %vm523_vm6 = vcmp.eq.f32.partialorder %v2577_v61, %v320_v24  ;;  %vm491_vm7 = vcmp.gt.f32.partialorder %v2577_v61, %v320_v24  ;;  %v2669_v24 = vperm.slane %v457_v0, 0 }
 0x16e   : > { %vm595_vm9 = vmand %vm523_vm6, %vm563_vm8  ;;  %vm565_vm6 = vcmp.le.s32.totalorder %v2620_v36, %v2477_v29 }
 0x16f   : > { %vm627_vm10 = vmor %vm491_vm7, %vm595_vm9 }
 0x170   : > { %v659_v40 = vsel %vm627_vm10, 1.0, %v3753_v26 }
 0x171   : > { %407 = vperm.xlu1 %2072, %v2464_v25   ;;  %713 = vadd.xlane.f32.xlu0 %v712_v34  ;;  %v2627_v43 = vmul.f32 %v659_v40, %v2577_v61  ;;  %v721_v54 = vsel %vm183_vm0, %v659_v40, 0.0 }
 0x172   : > { %413 = vperm.xlu2 %2073, %v2464_v25  }
 0x173   : > { %v295_v48 = vpop.permute.xlu1 %294  ;;  %v339_v52 = vpop.permute.xlu0 %338 }
 0x174   : > { %vm519_vm11 = vcmp.eq.f32.partialorder %v2535_v47, %v295_v48  ;;  %vm526_vm12 = vcmp.eq.f32.partialorder %v2624_v42, %v339_v52  ;;  %vm494_vm13 = vcmp.gt.f32.partialorder %v2624_v42, %v339_v52  ;;  %vm487_vm1 = vcmp.gt.f32.partialorder %v2535_v47, %v295_v48 }
 0x175   : > { %vm598_vm15 = vmand %vm526_vm12, %vm566_vm14  ;;  %vm562_vm14 = vcmp.le.s32.totalorder %v2579_v62, %v2485_v31 }
 0x176   : > { %vm630_vm2 = vmor %vm494_vm13, %vm598_vm15 }
 0x177   : > { %v662_v53 = vsel %vm630_vm2, 1.0, %v3753_v26  ;;  %vm591_vm4 = vmand %vm519_vm11, %vm559_vm3  ;;  %vm571_vm3 = vcmp.le.s32.totalorder %v2669_v24, %v2448_v19 }
 0x178   : > { %vm623_vm5 = vmor %vm487_vm1, %vm591_vm4  ;;  %v2641_v55 = vmul.f32 %v662_v53, %v2624_v42  ;;  %v730_v6 = vsel %vm183_vm0, %v662_v53, 0.0 }
 0x179   : > { %2074 = vset.pattern.permute.xlu1 %v2385_v8  ;;  %722 = vadd.xlane.f32.xlu0 %v721_v54  ;;  %v2645_v56 = vsel %vm623_vm5, 1.0, %v3753_v26 }
 0x17a   : > { %v2649_v57 = vmul.f32 %v2645_v56, %v2535_v47  ;;  %2075 = vset.pattern.permute.xlu2 %v2365_v1 }
 0x17c   : > { %v333_v44 = vpop.permute.xlu2 %332 }
 0x17d   : > { %vm525_vm7 = vcmp.eq.f32.partialorder %v2624_v42, %v333_v44  ;;  %vm493_vm8 = vcmp.gt.f32.partialorder %v2624_v42, %v333_v44 }
 0x17e   : > { %vm597_vm9 = vmand %vm525_vm7, %vm565_vm6 }
 0x17f   : > { %vm629_vm10 = vmor %vm493_vm8, %vm597_vm9  ;;  %vm568_vm8 = vcmp.le.s32.totalorder %v2669_v24, %v2439_v17  ;;  %vm509_vm9 = vcmp.eq.f32.partialorder %v2396_v12, %v2532_v46 }
 0x180   : > { %v2661_v47 = vsel %vm629_vm10, 1.0, %v3753_v26  ;;  %vm549_vm10 = vcmp.le.s32.totalorder %v2499_v35, %v2477_v29 }
 0x181   : > { %419 = vperm.xlu1 %2074, %v2464_v25   ;;  %731 = vadd.xlane.f32.xlu0 %v730_v6  ;;  %v2667_v9 = vmul.f32 %v2661_v47, %v2624_v42  ;;  %v691_v6 = vsel %vm183_vm0, %v2489_v32, 0.0 }
 0x183   : > { %v314_v10 = vpop.permute.xlu1 %313  ;;  %v370_v23 = vpop.permute.xlu0 %369 }
 0x184   : > { %vm522_vm11 = vcmp.eq.f32.partialorder %v2577_v61, %v314_v10  ;;  %vm531_vm12 = vcmp.eq.f32.partialorder %v2663_v7, %v370_v23  ;;  %vm490_vm13 = vcmp.gt.f32.partialorder %v2577_v61, %v314_v10  ;;  %vm499_vm1 = vcmp.gt.f32.partialorder %v2663_v7, %v370_v23 }
 0x185   : > { %vm594_vm15 = vmand %vm522_vm11, %vm562_vm14  ;;  %v688_v10 = vsel %vm183_vm0, %v2469_v27, 0.0  ;;  %v700_v23 = vsel %vm183_vm0, %v2570_v59, 0.0  ;;  %v451_v27 = vrot.slane %v2393_v11, 6 }
 0x186   : > { %vm626_vm2 = vmor %vm490_vm13, %vm594_vm15  ;;  %vm477_vm13 = vcmp.gt.f32.partialorder %v2396_v12, %v2532_v46 }
 0x187   : > { %v2680_v30 = vsel %vm626_vm2, 1.0, %v3753_v26  ;;  %vm603_vm4 = vmand %vm531_vm12, %vm571_vm3  ;;  %vm551_vm2 = vcmp.le.s32.totalorder %v2499_v35, %v2448_v19  ;;  %vm479_vm3 = vcmp.gt.f32.partialorder %v2396_v12, %v2530_v45 }
 0x188   : > { %vm635_vm5 = vmor %vm499_vm1, %vm603_vm4  ;;  %v2684_v34 = vmul.f32 %v2680_v30, %v2577_v61  ;;  %vm511_vm1 = vcmp.eq.f32.partialorder %v2396_v12, %v2530_v45 }
 0x189   : > { %v2687_v40 = vsel %vm635_vm5, 1.0, %v3753_v26  ;;  %2077 = vset.pattern.permute.xlu1 %v2372_v3  ;;  %vm581_vm14 = vmand %vm509_vm9, %vm549_vm10 }
 0x18a   : > { %v2692_v62 = vmul.f32 %v2687_v40, %v2663_v7  ;;  %vm613_vm15 = vmor %vm477_vm13, %vm581_vm14  ;;  %vm569_vm13 = vcmp.le.s32.totalorder %v2669_v24, %v2477_v29 }
 0x18b   : > { %v2716_v53 = vsel %vm613_vm15, 1.0, %v3753_v26  ;;  %vm583_vm4 = vmand %vm511_vm1, %vm551_vm2 }
 0x18c   : > { %v352_v48 = vpop.permute.xlu2 %351  ;;  %v679_v46 = vsel %vm183_vm0, %v2716_v53, 0.0  ;;  %vm615_vm5 = vmor %vm479_vm3, %vm583_vm4 }
 0x18d   : > { %vm528_vm6 = vcmp.eq.f32.partialorder %v2663_v7, %v352_v48  ;;  %vm496_vm7 = vcmp.gt.f32.partialorder %v2663_v7, %v352_v48  ;;  %v2727_v54 = vsel %vm615_vm5, 1.0, %v3753_v26 }
 0x18e   : > { %vm600_vm11 = vmand %vm528_vm6, %vm568_vm8  ;;  %vm508_vm6 = vcmp.eq.f32.partialorder %v2396_v12, %v2517_v39  ;;  %vm476_vm8 = vcmp.gt.f32.partialorder %v2396_v12, %v2517_v39  ;;  %v685_v44 = vsel %vm183_vm0, %v2727_v54, 0.0 }
 0x18f   : > { %vm632_vm12 = vmor %vm496_vm7, %vm600_vm11  ;;  %vm548_vm7 = vcmp.le.s32.totalorder %v2499_v35, %v2439_v17 }
 0x190   : > { %v2703_v61 = vsel %vm632_vm12, 1.0, %v3753_v26  ;;  %vm580_vm9 = vmand %vm508_vm6, %vm548_vm7 }
 0x191   : > { %v2709_v52 = vmul.f32 %v2703_v61, %v2663_v7  ;;  %vm612_vm10 = vmor %vm476_vm8, %vm580_vm9 }
 0x192   : > { %v2736_v63 = vsel %vm612_vm10, 1.0, %v3753_v26 }
 0x193   : > { %v2731_v45 = vpop.permute.xlu1 %326  ;;  %v676_v35 = vsel %vm183_vm0, %v2736_v63, 0.0 }
 0x194   : > { %vm524_vm10 = vcmp.eq.f32.partialorder %v2624_v42, %v2731_v45 }
 0x19b   : > { %680 = vadd.xlane.f32.xlu2 %v679_v46 }
 0x19c   : > { %v2744_v39 = vpop.permute.xlu2 %363 }
 0x1a3   : > { %686 = vadd.xlane.f32.xlu2 %v685_v44  ;;  %v2740_v0 = vpop.permute.xlu1 %344  ;;  %v458_v44 = vrot.slane %v2377_v5, 6 }
 0x1ab   : > { %677 = vadd.xlane.f32.xlu1 %v676_v35  ;;  %692 = vadd.xlane.f32.xlu2 %v691_v6  ;;  %v697_v6 = vsel %vm183_vm0, %v2511_v37, 0.0  ;;  %v3790_v37 = vmov 0.0  }
 0x1ac   : > { %v2754_v32 = vpop.permute.xlu2 %382 }
 0x1b3   : > { %v358_v48 = vpop.permute.xlu1 %357  ;;  %689 = vadd.xlane.f32.xlu1 %v688_v10  ;;  %701 = vadd.xlane.f32.xlu2 %v700_v23  ;;  %v709_v10 = vsel %vm183_vm0, %v2645_v56, 0.0  ;;  %v2767_v23 = vperm.slane %v451_v27, 0  ;;  %v706_v56 = vsel %vm183_vm0, %v2546_v50, 0.0 }
 0x1b4   : > { %vm529_vm11 = vcmp.eq.f32.partialorder %v2663_v7, %v358_v48  ;;  %vm497_vm12 = vcmp.gt.f32.partialorder %v2663_v7, %v358_v48  ;;  %v2769_v48 = vperm.slane %v458_v44, 0 }
 0x1b5   : > { %vm601_vm14 = vmand %vm529_vm11, %vm569_vm13  ;;  %vm492_vm13 = vcmp.gt.f32.partialorder %v2624_v42, %v2731_v45 }
 0x1b6   : > { %vm633_vm15 = vmor %vm497_vm12, %vm601_vm14  ;;  %vm575_vm3 = vcmp.le.s32.totalorder %v2769_v48, %v2448_v19  ;;  %vm572_vm8 = vcmp.le.s32.totalorder %v2769_v48, %v2439_v17  ;;  %vm564_vm12 = vcmp.le.s32.totalorder %v2620_v36, %v2439_v17 }
 0x1b7   : > { %v665_v46 = vsel %vm633_vm15, 1.0, %v3753_v26  ;;  %vm596_vm14 = vmand %vm524_vm10, %vm564_vm12 }
 0x1b8   : > { %v739_v59 = vsel %vm183_vm0, %v665_v46, 0.0  ;;  %v2761_v35 = vmul.f32 %v665_v46, %v2663_v7  ;;  %vm628_vm15 = vmor %vm492_vm13, %vm596_vm14  ;;  %vm574_vm13 = vcmp.le.s32.totalorder %v2769_v48, %v2485_v31 }
 0x1b9   : > { %740 = vadd.xlane.f32.xlu0 %v739_v59  ;;  %v718_v59 = vsel %vm183_vm0, %v2680_v30, 0.0  ;;  %v452_v30 = vrot.slane %v2393_v11, 7 }
 0x1bb   : > { %698 = vadd.xlane.f32.xlu1 %v697_v6  ;;  %710 = vadd.xlane.f32.xlu2 %v709_v10  ;;  %v2806_v11 = vperm.slane %v452_v30, 0 }
 0x1bc   : > { %v395_v26 = vpop.permute.xlu2 %394 }
 0x1bd   : > { %vm535_vm1 = vcmp.eq.f32.partialorder %v2767_v23, %v395_v26  ;;  %vm503_vm2 = vcmp.gt.f32.partialorder %v2767_v23, %v395_v26  ;;  %v459_v26 = vrot.slane %v2377_v5, 7 }
 0x1be   : > { %vm607_vm4 = vmand %vm535_vm1, %vm575_vm3  ;;  %vm527_vm1 = vcmp.eq.f32.partialorder %v2624_v42, %v2740_v0 }
 0x1bf   : > { %vm639_vm5 = vmor %vm503_vm2, %vm607_vm4 }
 0x1c0   : > { %v671_v46 = vsel %vm639_vm5, 1.0, %v3790_v37 }
 0x1c1   : > { %v2779_v27 = vmul.f32 %v671_v46, %v2767_v23 }
 0x1c3   : > { %v377_v44 = vpop.permute.xlu1 %376  ;;  %707 = vadd.xlane.f32.xlu1 %v706_v56  ;;  %719 = vadd.xlane.f32.xlu2 %v718_v59  ;;  %v715_v56 = vsel %vm183_vm0, %v2606_v21, 0.0  ;;  %v2802_v59 = vperm.slane %v459_v26, 0  ;;  %v2814_v21 = vsel %vm628_vm15, 1.0, %v3790_v37  ;;  %v736_v26 = vsel %vm183_vm0, %v2703_v61, 0.0 }
 0x1c4   : > { %vm532_vm6 = vcmp.eq.f32.partialorder %v2767_v23, %v377_v44  ;;  %vm500_vm7 = vcmp.gt.f32.partialorder %v2767_v23, %v377_v44  ;;  %v727_v44 = vsel %vm183_vm0, %v2661_v47, 0.0  ;;  %v757_v47 = vsel %vm183_vm0, %v671_v46, 0.0 }
 0x1c5   : > { %vm604_vm9 = vmand %vm532_vm6, %vm572_vm8  ;;  %vm578_vm3 = vcmp.le.s32.totalorder %v2802_v59, %v2485_v31  ;;  %vm567_vm6 = vcmp.le.s32.totalorder %v2620_v36, %v2448_v19  ;;  %v724_v45 = vsel %vm183_vm0, %v2814_v21, 0.0  ;;  %vm530_vm15 = vcmp.eq.f32.partialorder %v2663_v7, %v2744_v39 }
 0x1c6   : > { %vm636_vm11 = vmor %vm500_vm7, %vm604_vm9  ;;  %vm495_vm7 = vcmp.gt.f32.partialorder %v2624_v42, %v2740_v0 }
 0x1c7   : > { %v668_v50 = vsel %vm636_vm11, 1.0, %v3790_v37  ;;  %vm599_vm8 = vmand %vm527_vm1, %vm567_vm6  ;;  %vm533_vm6 = vcmp.eq.f32.partialorder %v2767_v23, %v2754_v32 }
 0x1c8   : > { %v748_v6 = vsel %vm183_vm0, %v668_v50, 0.0  ;;  %v2796_v10 = vmul.f32 %v668_v50, %v2767_v23  ;;  %vm631_vm11 = vmor %vm495_vm7, %vm599_vm8  ;;  %vm573_vm7 = vcmp.le.s32.totalorder %v2769_v48, %v2477_v29  ;;  %vm501_vm8 = vcmp.gt.f32.partialorder %v2767_v23, %v2754_v32 }
 0x1c9   : > { %749 = vadd.xlane.f32.xlu0 %v748_v6  ;;  %v2836_v61 = vsel %vm631_vm11, 1.0, %v3790_v37 }
 0x1cb   : > { %716 = vadd.xlane.f32.xlu1 %v715_v56  ;;  %728 = vadd.xlane.f32.xlu2 %v727_v44  ;;  %v733_v56 = vsel %vm183_vm0, %v2836_v61, 0.0  ;;  %v745_v44 = vsel %vm183_vm0, %v2687_v40, 0.0 }
 0x1cc   : > { %v414_v50 = vpop.permute.xlu2 %413 }
 0x1cd   : > { %vm538_vm2 = vcmp.eq.f32.partialorder %v2806_v11, %v414_v50  ;;  %vm506_vm4 = vcmp.gt.f32.partialorder %v2806_v11, %v414_v50  ;;  %v773_v50 = vmul.f32 %v2716_v53, %v2396_v12  ;;  %v402_v53 = vpop.permute.xlu0 %401 }
 0x1ce   : > { %vm610_vm5 = vmand %vm538_vm2, %vm578_vm3  ;;  %vm570_vm2 = vcmp.le.s32.totalorder %v2669_v24, %v2485_v31  ;;  %vm498_vm3 = vcmp.gt.f32.partialorder %v2663_v7, %v2744_v39 }
 0x1cf   : > { %vm642_vm9 = vmor %vm506_vm4, %vm610_vm5  ;;  %v807_v24 = vsel %vm183_vm0, %v773_v50, 0.0 }
 0x1d0   : > { %v2831_v36 = vsel %vm642_vm9, 1.0, %v3790_v37  ;;  %vm602_vm4 = vmand %vm530_vm15, %vm570_vm2  ;;  %vm536_vm15 = vcmp.eq.f32.partialorder %v2806_v11, %v402_v53  ;;  %vm576_vm2 = vcmp.le.s32.totalorder %v2802_v59, %v2439_v17  ;;  %v825_v17 = vsel %vm183_vm0, %v2515_v38, 0.0 }
 0x1d1   : > { %758 = vadd.xlane.f32.xlu0 %v757_v47  ;;  %v766_v46 = vsel %vm183_vm0, %v2831_v36, 0.0  ;;  %vm634_vm5 = vmor %vm498_vm3, %vm602_vm4  ;;  %vm504_vm3 = vcmp.gt.f32.partialorder %v2806_v11, %v402_v53  ;;  %v775_v38 = vmul.f32 %v2727_v54, %v2396_v12 }
 0x1d2   : > { %v2857_v31 = vsel %vm634_vm5, 1.0, %v3790_v37  ;;  %vm605_vm9 = vmand %vm533_vm6, %vm573_vm7 }
 0x1d3   : > { %v389_v30 = vpop.permute.xlu1 %388  ;;  %725 = vadd.xlane.f32.xlu1 %v724_v45  ;;  %737 = vadd.xlane.f32.xlu2 %v736_v26  ;;  %v742_v40 = vsel %vm183_vm0, %v2857_v31, 0.0  ;;  %v816_v45 = vsel %vm183_vm0, %v2473_v28, 0.0  ;;  %vm608_vm4 = vmand %vm536_vm15, %vm576_vm2 }
 0x1d4   : > { %vm534_vm10 = vcmp.eq.f32.partialorder %v2767_v23, %v389_v30  ;;  %vm502_vm12 = vcmp.gt.f32.partialorder %v2767_v23, %v389_v30  ;;  %vm640_vm5 = vmor %vm504_vm3, %vm608_vm4  ;;  %v772_v30 = vmul.f32 %v2736_v63, %v2396_v12 }
 0x1d5   : > { %vm606_vm14 = vmand %vm534_vm10, %vm574_vm13  ;;  %v672_v28 = vsel %vm640_vm5, 1.0, %v3790_v37  ;;  %vm1003_vm5 = vcmask 195712  }
 0x1d6   : > { %vm638_vm1 = vmor %vm502_vm12, %vm606_vm14  ;;  %vm577_vm12 = vcmp.le.s32.totalorder %v2802_v59, %v2477_v29 }
 0x1d7   : > { %v670_v0 = vsel %vm638_vm1, 1.0, %v3790_v37  ;;  %vm637_vm13 = vmor %vm501_vm8, %vm605_vm9  ;;  %vm579_vm8 = vcmp.le.s32.totalorder %v2802_v59, %v2448_v19  ;;  %v774_v19 = vmul.f32 %v2522_v41, %v2396_v12  ;;  %v843_v59 = vsel %vm183_vm0, %v2610_v22, 0.0 }
 0x1d8   : > { %v2844_v6 = vmul.f32 %v670_v0, %v2767_v23  ;;  %v754_v39 = vsel %vm183_vm0, %v670_v0, 0.0  ;;  %v669_v48 = vsel %vm637_vm13, 1.0, %v3790_v37  ;;  %v760_v0 = vsel %vm183_vm0, %v672_v28, 0.0 }
 0x1d9   : > { %767 = vadd.xlane.f32.xlu0 %v766_v46  ;;  %v751_v26 = vsel %vm183_vm0, %v669_v48, 0.0  ;;  %v804_v46 = vsel %vm183_vm0, %v772_v30, 0.0  ;;  %v810_v54 = vsel %vm183_vm0, %v774_v19, 0.0  ;;  %v819_v41 = vsel %vm183_vm0, %v2493_v33, 0.0 }
 0x1da   : > { %v831_v22 = vsel %vm183_vm0, %v2602_v20, 0.0  ;;  %v794_v33 = vmul.f32 %v2857_v31, %v2663_v7  ;;  %v858_v7 = vsel %vm183_vm0, %v2641_v55, 0.0  ;;  %v864_v30 = vsel %vm183_vm0, %v2709_v52, 0.0 }
 0x1db   : > { %734 = vadd.xlane.f32.xlu1 %v733_v56  ;;  %746 = vadd.xlane.f32.xlu2 %v745_v44  ;;  %v834_v44 = vsel %vm183_vm0, %v2550_v51, 0.0  ;;  %v788_v51 = vmul.f32 %v2814_v21, %v2624_v42  ;;  %v828_v21 = vsel %vm183_vm0, %v2574_v60, 0.0  ;;  %v797_v60 = vmul.f32 %v669_v48, %v2767_v23 }
 0x1dc   : > { %v870_v20 = vsel %vm183_vm0, %v794_v33, 0.0  ;;  %v855_v23 = vsel %vm183_vm0, %v2667_v9, 0.0  ;;  %v867_v48 = vsel %vm183_vm0, %v2761_v35, 0.0  ;;  %v876_v9 = vsel %vm183_vm0, %v2796_v10, 0.0 }
 0x1dd   : > { %v852_v53 = vsel %vm183_vm0, %v788_v51, 0.0  ;;  %v802_v52 = vmul.f32 %v2831_v36, %v2806_v11 }
 0x1e1   : > { %808 = vadd.xlane.f32.xlu0 %v807_v24  ;;  %v813_v24 = vsel %vm183_vm0, %v775_v38, 0.0  ;;  %v894_v38 = vsel %vm183_vm0, %v802_v52, 0.0 }
 0x1e3   : > { %v408_v47 = vpop.permute.xlu1 %407  ;;  %743 = vadd.xlane.f32.xlu1 %v742_v40  ;;  %755 = vadd.xlane.f32.xlu2 %v754_v39  ;;  %v822_v40 = vsel %vm183_vm0, %v2566_v58, 0.0  ;;  %v791_v39 = vmul.f32 %v2836_v61, %v2624_v42  ;;  %v837_v42 = vsel %vm183_vm0, %v2649_v57, 0.0  ;;  %v849_v61 = vsel %vm183_vm0, %v2627_v43, 0.0 }
 0x1e4   : > { %vm537_vm10 = vcmp.eq.f32.partialorder %v2806_v11, %v408_v47  ;;  %vm505_vm11 = vcmp.gt.f32.partialorder %v2806_v11, %v408_v47  ;;  %v840_v47 = vsel %vm183_vm0, %v2590_v4, 0.0  ;;  %v879_v4 = vsel %vm183_vm0, %v797_v60, 0.0 }
 0x1e5   : > { %vm609_vm14 = vmand %vm537_vm10, %vm577_vm12  ;;  %v861_v58 = vsel %vm183_vm0, %v791_v39, 0.0  ;;  %v800_v57 = vmul.f32 %v672_v28, %v2806_v11  ;;  %v873_v28 = vsel %vm183_vm0, %v2692_v62, 0.0 }
 0x1e6   : > { %vm641_vm1 = vmor %vm505_vm11, %vm609_vm14 }
 0x1e7   : > { %v2873_v32 = vsel %vm641_vm1, 1.0, %v3790_v37  ;;  %v888_v43 = vsel %vm183_vm0, %v800_v57, 0.0  ;;  %vm999_vm1 = vcmask 130112  }
 0x1e8   : > { %v763_v29 = vsel %vm183_vm0, %v2873_v32, 0.0 }
 0x1e9   : > { %817 = vadd.xlane.f32.xlu0 %v816_v45  ;;  %v846_v45 = vsel %vm183_vm0, %v2684_v34, 0.0 }
 0x1eb   : > { %752 = vadd.xlane.f32.xlu1 %v751_v26  ;;  %764 = vadd.xlane.f32.xlu2 %v763_v29 }
 0x1f1   : > { %826 = vadd.xlane.f32.xlu0 %v825_v17 }
 0x1f3   : > { %v420_v56 = vpop.permute.xlu1 %419  ;;  %761 = vadd.xlane.f32.xlu1 %v760_v0  ;;  %805 = vadd.xlane.f32.xlu2 %v804_v46  ;;  %v885_v0 = vsel %vm183_vm0, %v2779_v27, 0.0  ;;  %v2962_v46 = vpop.xlane.xlu0 %683  ;;  %v801_v27 = vmul.f32 %v2873_v32, %v2806_v11 }
 0x1f4   : > { %vm539_vm6 = vcmp.eq.f32.partialorder %v2806_v11, %v420_v56  ;;  %vm507_vm7 = vcmp.gt.f32.partialorder %v2806_v11, %v420_v56  ;;  %v882_v56 = vsel %vm183_vm0, %v2844_v6, 0.0 }
 0x1f5   : > { %vm611_vm9 = vmand %vm539_vm6, %vm579_vm8  ;;  %v891_v36 = vsel %vm183_vm0, %v801_v27, 0.0  ;;  %vm1007_vm6 = vcmask 261312  }
 0x1f6   : > { %vm643_vm10 = vmor %vm507_vm7, %vm611_vm9 }
 0x1f7   : > { %v675_v63 = vsel %vm643_vm10, 1.0, %v3790_v37 }
 0x1f8   : > { %v769_v50 = vsel %vm183_vm0, %v675_v63, 0.0  ;;  %v803_v55 = vmul.f32 %v675_v63, %v2806_v11 }
 0x1f9   : > { %835 = vadd.xlane.f32.xlu0 %v834_v44 }
 0x1fa   : > { %v897_v29 = vsel %vm183_vm0, %v803_v55, 0.0 }
 0x1fb   : > { %770 = vadd.xlane.f32.xlu1 %v769_v50  ;;  %814 = vadd.xlane.f32.xlu2 %v813_v24  ;;  %v2971_v62 = vpop.xlane.xlu0 %695 }
 0x201   : > { %844 = vadd.xlane.f32.xlu0 %v843_v59 }
 0x203   : > { %811 = vadd.xlane.f32.xlu1 %v810_v54  ;;  %823 = vadd.xlane.f32.xlu2 %v822_v40  ;;  %v2981_v50 = vpop.xlane.xlu0 %704 }
 0x209   : > { %853 = vadd.xlane.f32.xlu0 %v852_v53 }
 0x20b   : > { %820 = vadd.xlane.f32.xlu1 %v819_v41  ;;  %832 = vadd.xlane.f32.xlu2 %v831_v22  ;;  %v2989_v19 = vpop.xlane.xlu0 %713 }
 0x20e   : > { %v2937_v31 = vpop.xlane.xlu2 %680 }
 0x211   : > { %862 = vadd.xlane.f32.xlu0 %v861_v58 }
 0x213   : > { %829 = vadd.xlane.f32.xlu1 %v828_v21  ;;  %841 = vadd.xlane.f32.xlu2 %v840_v47  ;;  %v2997_v32 = vpop.xlane.xlu0 %722 }
 0x216   : > { %v2948_v26 = vpop.xlane.xlu2 %686 }
 0x219   : > { %871 = vadd.xlane.f32.xlu0 %v870_v20 }
 0x21b   : > { %838 = vadd.xlane.f32.xlu1 %v837_v42  ;;  %850 = vadd.xlane.f32.xlu2 %v849_v61  ;;  %v3006_v51 = vpop.xlane.xlu0 %731 }
 0x21e   : > { %v2944_v34 = vpop.xlane.xlu1 %677  ;;  %v2958_v17 = vpop.xlane.xlu2 %692 }
 0x221   : > { %880 = vadd.xlane.f32.xlu0 %v879_v4 }
 0x223   : > { %847 = vadd.xlane.f32.xlu1 %v846_v45  ;;  %859 = vadd.xlane.f32.xlu2 %v858_v7 }
 0x226   : > { %v2954_v35 = vpop.xlane.xlu1 %689  ;;  %v2973_v63 = vpop.xlane.xlu2 %701 }
 0x229   : > { %889 = vadd.xlane.f32.xlu0 %v888_v43 }
 0x22b   : > { %856 = vadd.xlane.f32.xlu1 %v855_v23  ;;  %868 = vadd.xlane.f32.xlu2 %v867_v48 }
 0x22c   : > { %v3013_v41 = vpop.xlane.xlu0 %740 }
 0x22e   : > { %v2966_v10 = vpop.xlane.xlu1 %698  ;;  %v2984_v6 = vpop.xlane.xlu2 %710 }
 0x231   : > { %898 = vadd.xlane.f32.xlu0 %v897_v29 }
 0x233   : > { %865 = vadd.xlane.f32.xlu1 %v864_v30  ;;  %877 = vadd.xlane.f32.xlu2 %v876_v9 }
 0x236   : > { %v2978_v44 = vpop.xlane.xlu1 %707  ;;  %v2991_v59 = vpop.xlane.xlu2 %719 }
 0x23b   : > { %874 = vadd.xlane.f32.xlu1 %v873_v28  ;;  %886 = vadd.xlane.f32.xlu2 %v885_v0 }
 0x23c   : > { %v3022_v58 = vpop.xlane.xlu0 %749 }
 0x23d   : > { %3794 = vst [vmem:[#allocation15_spill] sm:$0xff] %v3022_v58 }
 0x23e   : > { %v2986_v24 = vpop.xlane.xlu1 %716  ;;  %v2999_v54 = vpop.xlane.xlu2 %728 }
 0x243   : > { %883 = vadd.xlane.f32.xlu1 %v882_v56  ;;  %895 = vadd.xlane.f32.xlu2 %v894_v38 }
 0x244   : > { %v3031_v47 = vpop.xlane.xlu0 %758 }
 0x245   : > { %1168 = vperm.xlu0 %2076, %v2396_v12   ;;  %3797 = vst [vmem:[#allocation18_spill] sm:$0xff] %v3031_v47 }
 0x246   : > { %v2995_v11 = vpop.xlane.xlu1 %725  ;;  %v3010_v53 = vpop.xlane.xlu2 %737 }
 0x247   : > { %3791 = vst [vmem:[#allocation12_spill] sm:$0xff] %v3010_v53 }
 0x24b   : > { %892 = vadd.xlane.f32.xlu1 %v891_v36 }
 0x24c   : > { %v3043_v42 = vpop.xlane.xlu0 %767 }
 0x24d   : > { %1243 = vperm.xlu0 %2076, %v2423_v15   ;;  %3800 = vst [vmem:[#allocation21_spill] sm:$0xff] %v3043_v42 }
 0x24e   : > { %v3004_v40 = vpop.xlane.xlu1 %734  ;;  %v3020_v39 = vpop.xlane.xlu2 %746 }
 0x24f   : > { %3793 = vst [vmem:[#allocation14_spill] sm:$0xff] %v3020_v39 }
 0x254   : > { %v3051_v60 = vpop.xlane.xlu0 %808 }
 0x255   : > { %2089 = vset.pattern.permute.xlu0 %v2372_v3  ;;  %3803 = vst [vmem:[#allocation24_spill] sm:$0xff] %v3051_v60  ;;  %vm901_vm11 = vcmp.gt.f32.partialorder %v3051_v60, 1.0  ;;  %v3130_v60 = vadd.s32 4294967272, %v2377_v5 }
 0x256   : > { %v3015_v22 = vpop.xlane.xlu1 %743  ;;  %v933_v42 = vsel %vm901_vm11, 1.0, %v3790_v37 }
 0x257   : > { %3792 = vst [vmem:[#allocation13_spill] sm:$0xff] %v3015_v22 }
 0x25b   : > { %1162 = vperm.xlu2 %2075, %v2396_v12  }
 0x25c   : > { %v3059_v7 = vpop.xlane.xlu0 %817 }
 0x25d   : > { %1274 = vperm.xlu0 %2089, %v2432_v16   ;;  %3806 = vst [vmem:[#allocation27_spill] sm:$0xff] %v3059_v7  ;;  %vm904_vm14 = vcmp.gt.f32.partialorder %v3059_v7, 1.0 }
 0x25e   : > { %v3024_v21 = vpop.xlane.xlu1 %752  ;;  %v936_v47 = vsel %vm904_vm14, 1.0, %v3790_v37 }
 0x25f   : > { %3795 = vst [vmem:[#allocation16_spill] sm:$0xff] %v3024_v21 }
 0x263   : > { %1187 = vperm.xlu2 %2075, %v2399_v13  }
 0x264   : > { %1174 = vperm.xlu1 %2077, %v2396_v12   ;;  %v3067_v43 = vpop.xlane.xlu0 %826 }
 0x265   : > { %2090 = vset.pattern.permute.xlu0 %v2385_v8  ;;  %3809 = vst [vmem:[#allocation30_spill] sm:$0xff] %v3067_v43  ;;  %vm907_vm2 = vcmp.gt.f32.partialorder %v3067_v43, 1.0  ;;  %v1009_v43 = vperm.slane %v936_v47, %v2377_v5 }
 0x266   : > { %v3036_v33 = vpop.xlane.xlu1 %761 }
 0x267   : > { %3798 = vst [vmem:[#allocation19_spill] sm:$0xff] %v3036_v33 }
 0x26b   : > { %2079 = vset.pattern.permute.xlu2 %v2372_v3 }
 0x26c   : > { %2078 = vset.pattern.permute.xlu1 %v2369_v2  ;;  %v3077_v55 = vpop.xlane.xlu0 %835 }
 0x26d   : > { %1180 = vperm.xlu0 %2090, %v2396_v12   ;;  %v3029_v12 = vpop.xlane.xlu2 %755  ;;  %3812 = vst [vmem:[#allocation33_spill] sm:$0xff] %v3077_v55  ;;  %vm910_vm10 = vcmp.gt.f32.partialorder %v3077_v55, 1.0 }
 0x26e   : > { %3796 = vst [vmem:[#allocation17_spill] sm:$0xff] %v3029_v12  ;;  %v3045_v61 = vpop.xlane.xlu1 %770 }
 0x26f   : > { %3801 = vst [vmem:[#allocation22_spill] sm:$0xff] %v3045_v61 }
 0x273   : > { %1199 = vperm.xlu2 %2079, %v2399_v13  }
 0x274   : > { %1193 = vperm.xlu1 %2078, %v2399_v13   ;;  %v3085_v9 = vpop.xlane.xlu0 %844 }
 0x275   : > { %1305 = vperm.xlu0 %2090, %v2443_v18   ;;  %v3038_v20 = vpop.xlane.xlu2 %764  ;;  %3814 = vst [vmem:[#allocation35_spill] sm:$0xff] %v3085_v9  ;;  %vm913_vm11 = vcmp.gt.f32.partialorder %v3085_v9, 1.0 }
 0x276   : > { %3799 = vst [vmem:[#allocation20_spill] sm:$0xff] %v3038_v20  ;;  %v3053_v4 = vpop.xlane.xlu1 %811  ;;  %v3120_v20 = vadd.s32 4294967288, %v2377_v5 }
 0x277   : > { %3804 = vst [vmem:[#allocation25_spill] sm:$0xff] %v3053_v4  ;;  %vm902_vm15 = vcmp.gt.f32.partialorder %v3053_v4, 1.0 }
 0x278   : > { %v998_v12 = vperm.slane %v933_v42, %v3120_v20  ;;  %v934_v4 = vsel %vm902_vm15, 1.0, %v3790_v37 }
 0x27b   : > { %2081 = vset.pattern.permute.xlu2 %v2369_v2 }
 0x27c   : > { %2080 = vset.pattern.permute.xlu1 %v2385_v8 }
 0x27d   : > { %2095 = vset.pattern.permute.xlu0 %v2365_v1 }
 0x27e   : > { %v3061_v57 = vpop.xlane.xlu1 %820 }
 0x27f   : > { %3807 = vst [vmem:[#allocation28_spill] sm:$0xff] %v3061_v57  ;;  %vm905_vm13 = vcmp.gt.f32.partialorder %v3061_v57, 1.0 }
 0x283   : > { %1218 = vperm.xlu2 %2081, %v2414_v14  }
 0x284   : > { %1205 = vperm.xlu1 %2080, %v2399_v13   ;;  %v3049_v13 = vpop.xlane.xlu2 %805 }
 0x285   : > { %1212 = vperm.xlu0 %2095, %v2414_v14   ;;  %3802 = vst [vmem:[#allocation23_spill] sm:$0xff] %v3049_v13  ;;  %vm900_vm12 = vcmp.gt.f32.partialorder %v3049_v13, 1.0  ;;  %v937_v13 = vsel %vm905_vm13, 1.0, %v3790_v37 }
 0x286   : > { %v3071_v23 = vpop.xlane.xlu1 %829  ;;  %v932_v33 = vsel %vm900_vm12, 1.0, %v3790_v37  ;;  %v1010_v42 = vperm.slane %v937_v13, %v3120_v20 }
 0x287   : > { %3810 = vst [vmem:[#allocation31_spill] sm:$0xff] %v3071_v23  ;;  %vm908_vm3 = vcmp.gt.f32.partialorder %v3071_v23, 1.0  ;;  %v996_v7 = vperm.slane %v932_v33, %v2377_v5  ;;  %v939_v23 = vsel %vm907_vm2, 1.0, %v3790_v37 }
 0x288   : > { %v940_v33 = vsel %vm908_vm3, 1.0, %v3790_v37  ;;  %v1011_v55 = vsel %vm999_vm1, %v1010_v42, %v1009_v43 }
 0x289   : > { %v1016_v9 = vperm.slane %v940_v33, %v2377_v5  ;;  %v1014_v33 = vperm.slane %v939_v23, %v3130_v60 }
 0x28b   : > { %2083 = vset.pattern.permute.xlu2 %v2385_v8 }
 0x28c   : > { %2082 = vset.pattern.permute.xlu1 %v2372_v3  ;;  %v3057_v45 = vpop.xlane.xlu2 %814 }
 0x28d   : > { %1337 = vperm.xlu0 %2095, %v2464_v25   ;;  %3805 = vst [vmem:[#allocation26_spill] sm:$0xff] %v3057_v45  ;;  %vm903_vm9 = vcmp.gt.f32.partialorder %v3057_v45, 1.0 }
 0x28e   : > { %v3079_v29 = vpop.xlane.xlu1 %838  ;;  %v935_v39 = vsel %vm903_vm9, 1.0, %v3790_v37 }
 0x28f   : > { %vm911_vm2 = vcmp.gt.f32.partialorder %v3079_v29, 1.0 }
 0x293   : > { %1230 = vperm.xlu2 %2083, %v2414_v14  }
 0x294   : > { %1224 = vperm.xlu1 %2082, %v2414_v14   ;;  %v3065_v14 = vpop.xlane.xlu2 %823 }
 0x295   : > { %3808 = vst [vmem:[#allocation29_spill] sm:$0xff] %v3065_v14  ;;  %vm906_vm4 = vcmp.gt.f32.partialorder %v3065_v14, 1.0 }
 0x296   : > { %v3087_v28 = vpop.xlane.xlu1 %847  ;;  %v938_v13 = vsel %vm906_vm4, 1.0, %v3790_v37 }
 0x297   : > { %3815 = vst [vmem:[#allocation36_spill] sm:$0xff] %v3087_v28  ;;  %vm914_vm4 = vcmp.gt.f32.partialorder %v3087_v28, 1.0 }
 0x29b   : > { %2085 = vset.pattern.permute.xlu2 %v2372_v3 }
 0x29c   : > { %2084 = vset.pattern.permute.xlu1 %v2365_v1  ;;  %v3073_v48 = vpop.xlane.xlu2 %832 }
 0x29d   : > { %3811 = vst [vmem:[#allocation32_spill] sm:$0xff] %v3073_v48  ;;  %vm909_vm7 = vcmp.gt.f32.partialorder %v3073_v48, 1.0 }
 0x29e   : > { %v3095_v52 = vpop.xlane.xlu1 %856  ;;  %v941_v48 = vsel %vm909_vm7, 1.0, %v3790_v37 }
 0x29f   : > { %3818 = vst [vmem:[#allocation39_spill] sm:$0xff] %v3095_v52  ;;  %v1017_v43 = vperm.slane %v941_v48, %v3120_v20  ;;  %vm917_vm15 = vcmp.gt.f32.partialorder %v3095_v52, 1.0 }
 0x2a3   : > { %1249 = vperm.xlu2 %2085, %v2423_v15  }
 0x2a4   : > { %1237 = vperm.xlu1 %2084, %v2423_v15   ;;  %v3083_v30 = vpop.xlane.xlu2 %841 }
 0x2a5   : > { %3813 = vst [vmem:[#allocation34_spill] sm:$0xff] %v3083_v30  ;;  %vm912_vm8 = vcmp.gt.f32.partialorder %v3083_v30, 1.0  ;;  %v1000_v30 = vsel %vm999_vm1, %v998_v12, %v996_v7  ;;  %v945_v12 = vsel %vm913_vm11, 1.0, %v3790_v37 }
 0x2a6   : > { %v3105_v27 = vpop.xlane.xlu1 %865  ;;  %v944_v45 = vsel %vm912_vm8, 1.0, %v3790_v37 }
 0x2a7   : > { %3820 = vst [vmem:[#allocation41_spill] sm:$0xff] %v3105_v27  ;;  %v1023_v42 = vperm.slane %v944_v45, %v2377_v5  ;;  %vm920_vm8 = vcmp.gt.f32.partialorder %v3105_v27, 1.0 }
 0x2ab   : > { %2087 = vset.pattern.permute.xlu2 %v2365_v1 }
 0x2ac   : > { %2086 = vset.pattern.permute.xlu1 %v2385_v8  ;;  %v3091_v0 = vpop.xlane.xlu2 %850 }
 0x2ad   : > { %3816 = vst [vmem:[#allocation37_spill] sm:$0xff] %v3091_v0  ;;  %vm915_vm3 = vcmp.gt.f32.partialorder %v3091_v0, 1.0 }
 0x2ae   : > { %v3113_v61 = vpop.xlane.xlu1 %874 }
 0x2af   : > { %3823 = vst [vmem:[#allocation44_spill] sm:$0xff] %v3113_v61 }
 0x2b3   : > { %1262 = vperm.xlu2 %2087, %v2432_v16  }
 0x2b4   : > { %1255 = vperm.xlu1 %2086, %v2423_v15   ;;  %v3093_v15 = vpop.xlane.xlu0 %853  ;;  %v3099_v56 = vpop.xlane.xlu2 %859 }
 0x2b5   : > { %3817 = vst [vmem:[#allocation38_spill] sm:$0xff] %v3093_v15  ;;  %vm916_vm12 = vcmp.gt.f32.partialorder %v3093_v15, 1.0  ;;  %vm918_vm7 = vcmp.gt.f32.partialorder %v3099_v56, 1.0 }
 0x2b6   : > { %v3145_v21 = vpop.xlane.xlu1 %883  ;;  %v948_v58 = vsel %vm916_vm12, 1.0, %v3790_v37 }
 0x2b7   : > { %3825 = vst [vmem:[#allocation46_spill] sm:$0xff] %v3145_v21  ;;  %v1030_v23 = vperm.slane %v948_v58, %v2377_v5 }
 0x2bb   : > { %2091 = vset.pattern.permute.xlu2 %v2385_v8 }
 0x2bc   : > { %2088 = vset.pattern.permute.xlu1 %v2369_v2  ;;  %v3101_v38 = vpop.xlane.xlu0 %862 }
 0x2bd   : > { %3819 = vst [vmem:[#allocation40_spill] sm:$0xff] %v3101_v38  ;;  %vm919_vm13 = vcmp.gt.f32.partialorder %v3101_v38, 1.0  ;;  %v1006_v38 = vperm.slane %v935_v39, %v3130_v60 }
 0x2be   : > { %v3184_v22 = vsel %vm919_vm13, 1.0, %v3790_v37  ;;  %v3200_v48 = vpop.xlane.xlu1 %892 }
 0x2bf   : > { %3827 = vst [vmem:[#allocation48_spill] sm:$0xff] %v3200_v48  ;;  %vm929_vm9 = vcmp.gt.f32.partialorder %v3200_v48, 1.0 }
 0x2c3   : > { %1280 = vperm.xlu2 %2091, %v2432_v16  }
 0x2c4   : > { %1268 = vperm.xlu1 %2088, %v2432_v16   ;;  %v3107_v16 = vpop.xlane.xlu2 %868  ;;  %v3111_v36 = vpop.xlane.xlu0 %871 }
 0x2c5   : > { %3821 = vst [vmem:[#allocation42_spill] sm:$0xff] %v3107_v16  ;;  %vm922_vm14 = vcmp.gt.f32.partialorder %v3111_v36, 1.0 }
 0x2c6   : > { %3822 = vst [vmem:[#allocation43_spill] sm:$0xff] %v3111_v36  ;;  %v1024_v36 = vperm.slane %v945_v12, %v3120_v20 }
 0x2c8   : > { %v1025_v12 = vsel %vm999_vm1, %v1024_v36, %v1023_v42  ;;  %v946_v36 = vsel %vm914_vm4, 1.0, %v3790_v37  ;;  %vm1062_vm4 = vcmask 1043459  }
 0x2cb   : > { %2093 = vset.pattern.permute.xlu2 %v2369_v2 }
 0x2cc   : > { %2092 = vset.pattern.permute.xlu1 %v2365_v1  ;;  %v3136_v57 = vpop.xlane.xlu0 %880 }
 0x2cd   : > { %vm925_vm11 = vcmp.gt.f32.partialorder %v3136_v57, 1.0 }
 0x2d3   : > { %1293 = vperm.xlu2 %2093, %v2443_v18  }
 0x2d4   : > { %1287 = vperm.xlu1 %2092, %v2443_v18  }
 0x2db   : > { %2096 = vset.pattern.permute.xlu2 %v2365_v1  ;;  %v3123_v1 = vpop.xlane.xlu2 %877 }
 0x2dc   : > { %2094 = vset.pattern.permute.xlu1 %v2372_v3  ;;  %3824 = vst [vmem:[#allocation45_spill] sm:$0xff] %v3123_v1  ;;  %vm924_vm13 = vcmp.gt.f32.partialorder %v3123_v1, 1.0 }
 0x2dd   : > { %v956_v48 = vsel %vm924_vm13, 1.0, %v3790_v37  ;;  %vm1068_vm13 = vcmask 1046534  }
 0x2de   : > { %v1044_v0 = vperm.slane %v956_v48, %v2377_v5 }
 0x2e3   : > { %1312 = vperm.xlu2 %2096, %v2542_v49   ;;  %v3170_v14 = vpop.xlane.xlu2 %886 }
 0x2e4   : > { %1299 = vperm.xlu1 %2094, %v2443_v18   ;;  %v3133_v18 = vadd.s32 4294967280, %v2377_v5  ;;  %3826 = vst [vmem:[#allocation47_spill] sm:$0xff] %v3170_v14 }
 0x2e6   : > { %v1002_v47 = vperm.slane %v934_v4, %v3133_v18  ;;  %v942_v4 = vsel %vm910_vm10, 1.0, %v3790_v37  ;;  %v1012_v7 = vperm.slane %v938_v13, %v3133_v18  ;;  %v3186_v13 = vpop.xlane.xlu0 %889  ;;  %vm1058_vm10 = vcmask 1041409  }
 0x2e7   : > { %v1019_v45 = vperm.slane %v942_v4, %v3133_v18  ;;  %v943_v4 = vsel %vm911_vm2, 1.0, %v3790_v37  ;;  %vm928_vm12 = vcmp.gt.f32.partialorder %v3186_v13, 1.0  ;;  %vm1060_vm2 = vcmask 1042434  }
 0x2e8   : > { %v1004_v15 = vsel %vm1003_vm5, %v1002_v47, %v1000_v30  ;;  %v1013_v53 = vsel %vm1003_vm5, %v1012_v7, %v1011_v55  ;;  %v1018_v30 = vsel %vm999_vm1, %v1017_v43, %v1016_v9  ;;  %v3191_v47 = vsel %vm922_vm14, 1.0, %v3790_v37 }
 0x2e9   : > { %v3196_v39 = vsel %vm1007_vm6, %v1006_v38, %v1004_v15  ;;  %v3204_v55 = vsel %vm1007_vm6, %v1014_v33, %v1013_v53  ;;  %v1020_v58 = vsel %vm1003_vm5, %v1019_v45, %v1018_v30  ;;  %v949_v38 = vsel %vm917_vm15, 1.0, %v3790_v37 }
 0x2ea   : > { %v947_v53 = vsel %vm915_vm3, 1.0, %v3790_v37  ;;  %vm921_vm14 = vcmp.gt.f32.partialorder %v3107_v16, 1.0  ;;  %v1031_v7 = vperm.slane %v949_v38, %v3120_v20  ;;  %vm926_vm15 = vcmp.gt.f32.partialorder %v3145_v21, 1.0 }
 0x2eb   : > { %2098 = vset.pattern.permute.xlu2 %v2372_v3  ;;  %v3226_v43 = vpop.xlane.xlu2 %895  ;;  %v1021_v42 = vperm.slane %v943_v4, %v3130_v60  ;;  %v950_v33 = vsel %vm918_vm7, 1.0, %v3790_v37  ;;  %v952_v30 = vsel %vm920_vm8, 1.0, %v3790_v37  ;;  %v961_v45 = vsel %vm929_vm9, 1.0, %v3790_v37 }
 0x2ec   : > { %2097 = vset.pattern.permute.xlu1 %v2369_v2  ;;  %3828 = vst [vmem:[#allocation49_spill] sm:$0xff] %v3226_v43  ;;  %v957_v15 = vsel %vm925_vm11, 1.0, %v3790_v37  ;;  %v960_v9 = vsel %vm928_vm12, 1.0, %v3790_v37  ;;  %vm923_vm3 = vcmp.gt.f32.partialorder %v3113_v61, 1.0  ;;  %v1026_v38 = vperm.slane %v946_v36, %v3133_v18 }
 0x2ed   : > { %v953_v21 = vsel %vm921_vm14, 1.0, %v3790_v37  ;;  %vm930_vm7 = vcmp.gt.f32.partialorder %v3226_v43, 1.0  ;;  %v958_v1 = vsel %vm926_vm15, 1.0, %v3790_v37  ;;  %v1033_v16 = vperm.slane %v950_v33, %v3133_v18 }
 0x2ee   : > { %v3239_v4 = vpop.xlane.xlu0 %898  ;;  %v1032_v27 = vsel %vm999_vm1, %v1031_v7, %v1030_v23  ;;  %v1037_v52 = vperm.slane %v952_v30, %v2377_v5  ;;  %v1052_v61 = vperm.slane %v961_v45, %v3120_v20  ;;  %v1051_v36 = vperm.slane %v960_v9, %v2377_v5 }
 0x2ef   : > { %3829 = vst [vmem:[#allocation50_spill] sm:$0xff] %v3239_v4  ;;  %vm927_vm8 = vcmp.gt.f32.partialorder %v3170_v14, 1.0  ;;  %v955_v43 = vsel %vm923_vm3, 1.0, %v3790_v37  ;;  %v1038_v28 = vperm.slane %v953_v21, %v3120_v20  ;;  %vm931_vm9 = vcmp.gt.f32.partialorder %v3239_v4, 1.0 }
 0x2f0   : > { %v1047_v23 = vperm.slane %v958_v1, %v3133_v18  ;;  %v1028_v7 = vperm.slane %v947_v53, %v3130_v60  ;;  %v1045_v33 = vperm.slane %v957_v15, %v3120_v20  ;;  %v1027_v9 = vsel %vm1003_vm5, %v1026_v38, %v1025_v12 }
 0x2f1   : > { %v1034_v48 = vsel %vm1003_vm5, %v1033_v16, %v1032_v27  ;;  %v1039_v30 = vsel %vm999_vm1, %v1038_v28, %v1037_v52  ;;  %v959_v45 = vsel %vm927_vm8, 1.0, %v3790_v37  ;;  %v1042_v21 = vperm.slane %v955_v43, %v3130_v60 }
 0x2f2   : > { %v1053_v4 = vsel %vm999_vm1, %v1052_v61, %v1051_v36  ;;  %v1022_v14 = vsel %vm1007_vm6, %v1021_v42, %v1020_v58  ;;  %v963_v1 = vsel %vm931_vm9, 1.0, %v3790_v37  ;;  %v1046_v53 = vsel %vm999_vm1, %v1045_v33, %v1044_v0 }
 0x2f3   : > { %1324 = vperm.xlu2 %2098, %v2542_v49   ;;  %v1059_v27 = vsel %vm1058_vm10, %v3204_v55, %v3196_v39  ;;  %v1029_v28 = vsel %vm1007_vm6, %v1028_v7, %v1027_v9  ;;  %v1048_v52 = vsel %vm1003_vm5, %v1047_v23, %v1046_v53  ;;  %vm1064_vm11 = vcmask 1044484   ;;  %v1175_v7 = vpop.permute.xlu1 %1174 }
 0x2f4   : > { %v1049_v16 = vperm.slane %v959_v45, %v3130_v60  ;;  %v3830_v61 = vperm.slane %v3184_v22, %v3130_v60  ;;  %v3831_v12 = vperm.slane %v3191_v47, %v3133_v18  ;;  %v1061_v55 = vsel %vm1060_vm2, %v1022_v14, %v1059_v27 }
 0x2f5   : > { %v1056_v43 = vperm.slane %v963_v1, %v3130_v60  ;;  %vm1066_vm12 = vcmask 1045509   ;;  %v1063_v22 = vsel %vm1062_vm4, %v1029_v28, %v1061_v55  ;;  %vm1070_vm14 = vcmask 1047559  }
 0x2f6   : > { %v1036_v0 = vsel %vm1007_vm6, %v3830_v61, %v1034_v48  ;;  %v1041_v58 = vsel %vm1003_vm5, %v3831_v12, %v1039_v30  ;;  %v1050_v38 = vsel %vm1007_vm6, %v1049_v16, %v1048_v52  ;;  %v1169_v1 = vpop.permute.xlu0 %1168 }
 0x2f7   : > { %v1043_v42 = vsel %vm1007_vm6, %v1042_v21, %v1041_v58  ;;  %v1065_v47 = vsel %vm1064_vm11, %v1036_v0, %v1063_v22  ;;  %v2244_v21 = vmov 0  }
 0x2f8   : > { %2104 = vset.pattern.permute.xlu0 %v2244_v21 }
 0x2fb   : > { %2100 = vset.pattern.permute.xlu2 %v2369_v2  ;;  %v962_v2 = vsel %vm930_vm7, 1.0, %v3790_v37  ;;  %v1194_v33 = vpop.permute.xlu1 %1193 }
 0x2fc   : > { %v1054_v15 = vperm.slane %v962_v2, %v3133_v18  ;;  %v1067_v2 = vsel %vm1066_vm12, %v1043_v42, %v1065_v47 }
 0x2fe   : > { %v1055_v39 = vsel %vm1003_vm5, %v1054_v15, %v1053_v4  ;;  %v1069_v4 = vsel %vm1068_vm13, %v1050_v38, %v1067_v2 }
 0x2ff   : > { %v1057_v36 = vsel %vm1007_vm6, %v1056_v43, %v1055_v39 }
 0x300   : > { %v1071_v14 = vsel %vm1070_vm14, %v1057_v36, %v1069_v4 }
 0x301   : > { %v1073_v23 = vsel %vm183_vm0, %v1071_v14, 0.0 }
 0x303   : > { %1343 = vperm.xlu2 %2100, %v2464_v25   ;;  %v1206_v9 = vpop.permute.xlu1 %1205 }
 0x30b   : > { %2102 = vset.pattern.permute.xlu2 %v2385_v8  ;;  %v3302_v48 = vpop.permute.xlu1 %1224 }
 0x30e   : > { %1074 = vadd.xlane.f32.xlu1 %v1073_v23 }
 0x313   : > { %1355 = vperm.xlu2 %2102, %v2464_v25  }
 0x316   : > { %v3304_v30 = vpop.permute.xlu1 %1237 }
 0x31b   : > { %2105 = vset.pattern.permute.xlu2 %v2244_v21 }
 0x326   : > { %v3306_v45 = vpop.permute.xlu1 %1255 }
 0x327   : > { %1318 = vperm.xlu1 %2097, %v2542_v49  }
 0x32f   : > { %2099 = vset.pattern.permute.xlu1 %v2385_v8 }
 0x336   : > { %v3308_v8 = vpop.permute.xlu1 %1268 }
 0x337   : > { %1330 = vperm.xlu1 %2099, %v2542_v49  }
 0x33f   : > { %2101 = vset.pattern.permute.xlu1 %v2372_v3  ;;  %v1163_v3 = vpop.permute.xlu2 %1162 }
 0x346   : > { %v3310_v49 = vpop.permute.xlu1 %1287 }
 0x347   : > { %1349 = vperm.xlu1 %2101, %v2464_v25   ;;  %v3314_v25 = vpop.permute.xlu0 %1243  ;;  %v1188_v15 = vpop.permute.xlu2 %1187 }
 0x34f   : > { %2103 = vset.pattern.permute.xlu1 %v2244_v21  ;;  %v3319_v16 = vpop.permute.xlu0 %1274  ;;  %v1200_v0 = vpop.permute.xlu2 %1199 }
 0x356   : > { %v3312_v53 = vpop.permute.xlu1 %1299 }
 0x357   : > { %v1219_v22 = vpop.permute.xlu2 %1218 }
 0x35f   : > { %v1231_v23 = vpop.permute.xlu2 %1230 }
 0x381   : > { %v1075_v27 = vpop.xlane.xlu1 %1074 }
 0x382   : > { %v3316_v28 = vmax.f32 %v1075_v27, 1.0 }
 0x384   : > { %v1078_v52 = vperm.slane %v3316_v28, 0  ;;  %v1079_v61 = vperm.slane %v3316_v28, 1  ;;  %v1080_v36 = vperm.slane %v3316_v28, 2  ;;  %2106 = vrcp.f32 %v3316_v28 }
 0x386   : > { %vm1096_vm15 = vcmp.eq.f32.partialorder %v2962_v46, %v1078_v52  ;;  %vm1094_vm3 = vcmp.eq.f32.partialorder %v2944_v34, %v1078_v52  ;;  %vm1095_vm7 = vcmp.eq.f32.partialorder %v2937_v31, %v1078_v52  ;;  %vm1098_vm8 = vcmp.eq.f32.partialorder %v2954_v35, %v1079_v61  ;;  %v1181_v31 = vpop.permute.xlu0 %1180 }
 0x387   : > { %v3326_v12 = vsel %vm1096_vm15, 1.0, %v3790_v37  ;;  %v3329_v58 = vsel %vm1094_vm3, 1.0, %v3790_v37  ;;  %v3332_v39 = vsel %vm1095_vm7, 1.0, %v3790_v37  ;;  %vm1097_vm9 = vcmp.eq.f32.partialorder %v2948_v26, %v1078_v52 }
 0x388   : > { %v1391_v55 = vmul.f32 %v1175_v7, %v3326_v12  ;;  %v1389_v46 = vmul.f32 %v1163_v3, %v3329_v58  ;;  %v1390_v34 = vmul.f32 %v1169_v1, %v3332_v39  ;;  %vm1100_vm15 = vcmp.eq.f32.partialorder %v2971_v62, %v1079_v61  ;;  %v1250_v3 = vpop.permute.xlu2 %1249 }
 0x389   : > { %v3341_v43 = vsel %vm1098_vm8, 1.0, %v3790_v37  ;;  %v3344_v42 = vsel %vm1097_vm9, 1.0, %v3790_v37  ;;  %v3347_v38 = vsel %vm1100_vm15, 1.0, %v3790_v37  ;;  %vm1101_vm3 = vcmp.eq.f32.partialorder %v2966_v10, %v1079_v61 }
 0x38a   : > { %1460 = vperm.xlu2 %2105, %v1391_v55   ;;  %1454 = vperm.xlu1 %2103, %v1389_v46   ;;  %v1393_v35 = vmul.f32 %v1188_v15, %v3341_v43  ;;  %v1392_v26 = vmul.f32 %v1181_v31, %v3344_v42  ;;  %v1395_v47 = vmul.f32 %v1200_v0, %v3347_v38  ;;  %v3357_v62 = vsel %vm1101_vm3, 1.0, %v3790_v37 }
 0x38b   : > { %1457 = vperm.xlu0 %2104, %v1390_v34   ;;  %vm1099_vm7 = vcmp.eq.f32.partialorder %v2958_v17, %v1079_v61  ;;  %vm1103_vm8 = vcmp.eq.f32.partialorder %v2981_v50, %v1080_v36  ;;  %v1081_v7 = vperm.slane %v3316_v28, 3  ;;  %v1396_v10 = vmul.f32 %v1206_v9, %v3357_v62 }
 0x38c   : > { %v3360_v2 = vsel %vm1099_vm7, 1.0, %v3790_v37  ;;  %v3363_v4 = vsel %vm1103_vm8, 1.0, %v3790_v37  ;;  %vm1104_vm9 = vcmp.eq.f32.partialorder %v2978_v44, %v1080_v36  ;;  %vm1102_vm15 = vcmp.eq.f32.partialorder %v2973_v63, %v1080_v36 }
 0x38d   : > { %v1394_v17 = vmul.f32 %v1194_v33, %v3360_v2  ;;  %v1398_v50 = vmul.f32 %v1219_v22, %v3363_v4  ;;  %vm1106_vm3 = vcmp.eq.f32.partialorder %v2989_v19, %v1081_v7  ;;  %v3375_v21 = vsel %vm1104_vm9, 1.0, %v3790_v37 }
 0x38e   : > { %v3365_v14 = vpop.permute.xlu0 %1305  ;;  %v3378_v1 = vsel %vm1102_vm15, 1.0, %v3790_v37  ;;  %v3381_v9 = vsel %vm1106_vm3, 1.0, %v3790_v37  ;;  %v1399_v15 = vmul.f32 %v3302_v48, %v3375_v21  ;;  %vm1107_vm7 = vcmp.eq.f32.partialorder %v2986_v24, %v1081_v7 }
 0x38f   : > { %v1401_v63 = vmul.f32 %v3304_v30, %v3381_v9  ;;  %vm1105_vm8 = vcmp.eq.f32.partialorder %v2984_v6, %v1080_v36  ;;  %vm1109_vm9 = vcmp.eq.f32.partialorder %v2997_v32, %v1081_v7  ;;  %v3392_v19 = vsel %vm1107_vm7, 1.0, %v3790_v37 }
 0x390   : > { %v3395_v27 = vsel %vm1105_vm8, 1.0, %v3790_v37  ;;  %v3398_v48 = vsel %vm1109_vm9, 1.0, %v3790_v37  ;;  %v1082_v30 = vperm.slane %v3316_v28, 4  ;;  %v1263_v52 = vpop.permute.xlu2 %1262  ;;  %v1402_v24 = vmul.f32 %v3314_v25, %v3392_v19 }
 0x391   : > { %v1400_v6 = vmul.f32 %v1231_v23, %v3395_v27  ;;  %v1404_v32 = vmul.f32 %v3306_v45, %v3398_v48  ;;  %vm1108_vm3 = vcmp.eq.f32.partialorder %v2991_v59, %v1081_v7  ;;  %v1083_v45 = vperm.slane %v3316_v28, 5 }
 0x392   : > { %1466 = vperm.xlu2 %2105, %v1393_v35   ;;  %1463 = vperm.xlu1 %2103, %v1392_v26   ;;  %vm1110_vm15 = vcmp.eq.f32.partialorder %v2995_v11, %v1082_v30  ;;  %vm1112_vm7 = vcmp.eq.f32.partialorder %v3006_v51, %v1082_v30  ;;  %v3413_v0 = vsel %vm1108_vm3, 1.0, %v3790_v37  ;;  %vm1113_vm8 = vcmp.eq.f32.partialorder %v3004_v40, %v1082_v30  ;;  %v3833_v35 = vld [vmem:[#allocation12_spill] sm:$0xff]  ;;  %v3834_v26 = vld [vmem:[#allocation15_spill] sm:$0xff] }
 0x393   : > { %1472 = vperm.xlu0 %2104, %v1395_v47   ;;  %v3410_v61 = vsel %vm1110_vm15, 1.0, %v3790_v37  ;;  %v3416_v25 = vsel %vm1112_vm7, 1.0, %v3790_v37  ;;  %v1403_v11 = vmul.f32 %v1250_v3, %v3413_v0  ;;  %vm1111_vm9 = vcmp.eq.f32.partialorder %v2999_v54, %v1082_v30  ;;  %v3835_v3 = vld [vmem:[#allocation14_spill] sm:$0xff] }
 0x394   : > { %v1405_v46 = vmul.f32 %v1263_v52, %v3410_v61  ;;  %v1407_v59 = vmul.f32 %v3319_v16, %v3416_v25  ;;  %vm1115_vm15 = vcmp.eq.f32.partialorder %v3013_v41, %v1083_v45  ;;  %v3427_v51 = vsel %vm1113_vm8, 1.0, %v3790_v37  ;;  %v3832_v41 = vld [vmem:[#allocation13_spill] sm:$0xff] }
 0x395   : > { %v3430_v34 = vsel %vm1111_vm9, 1.0, %v3790_v37  ;;  %v3433_v31 = vsel %vm1115_vm15, 1.0, %v3790_v37  ;;  %v1084_v16 = vperm.slane %v3316_v28, 6  ;;  %vm1116_vm3 = vcmp.eq.f32.partialorder %v3832_v41, %v1083_v45 }
 0x396   : > { %v1213_v33 = vpop.permute.xlu0 %1212  ;;  %v1406_v54 = vmul.f32 %v3308_v8, %v3430_v34  ;;  %vm1114_vm7 = vcmp.eq.f32.partialorder %v3833_v35, %v1083_v45  ;;  %v3444_v47 = vsel %vm1116_vm3, 1.0, %v3790_v37  ;;  %vm1117_vm9 = vcmp.eq.f32.partialorder %v3835_v3, %v1083_v45  ;;  %v3838_v45 = vld [vmem:[#allocation17_spill] sm:$0xff] }
 0x397   : > { %v1397_v44 = vmul.f32 %v1213_v33, %v3378_v1  ;;  %vm1118_vm8 = vcmp.eq.f32.partialorder %v3834_v26, %v1084_v16  ;;  %v3447_v23 = vsel %vm1114_vm7, 1.0, %v3790_v37  ;;  %vm1120_vm7 = vcmp.eq.f32.partialorder %v3838_v45, %v1084_v16  ;;  %v3841_v26 = vld [vmem:[#allocation20_spill] sm:$0xff] }
 0x398   : > { %v1281_v55 = vpop.permute.xlu2 %1280  ;;  %v3450_v8 = vsel %vm1118_vm8, 1.0, %v3790_v37  ;;  %v1634_v45 = vmul.f32 %v3416_v25, %v3099_v56 }
 0x399   : > { %v1408_v36 = vmul.f32 %v1281_v55, %v3427_v51  ;;  %v1319_v7 = vpop.permute.xlu1 %1318 }
 0x39a   : > { %1475 = vperm.xlu2 %2105, %v1396_v10   ;;  %1469 = vperm.xlu1 %2103, %v1394_v17   ;;  %v1411_v17 = vmul.f32 %v3312_v53, %v3444_v47  ;;  %v1085_v53 = vperm.slane %v3316_v28, 7 }
 0x39b   : > { %1481 = vperm.xlu0 %2104, %v1398_v50   ;;  %v1409_v50 = vmul.f32 %v3310_v49, %v3447_v23 }
 0x3a0   : > { %v1294_v22 = vpop.permute.xlu2 %1293 }
 0x3a1   : > { %v1410_v40 = vmul.f32 %v1294_v22, %v3433_v31 }
 0x3a2   : > { %1484 = vperm.xlu2 %2105, %v1399_v15   ;;  %1478 = vperm.xlu1 %2103, %v1397_v44   ;;  %v3836_v15 = vld [vmem:[#allocation16_spill] sm:$0xff]  ;;  %v3837_v44 = vld [vmem:[#allocation18_spill] sm:$0xff] }
 0x3a3   : > { %1490 = vperm.xlu0 %2104, %v1401_v63   ;;  %vm1119_vm15 = vcmp.eq.f32.partialorder %v3836_v15, %v1084_v16  ;;  %vm1121_vm3 = vcmp.eq.f32.partialorder %v3837_v44, %v1084_v16  ;;  %v3461_v63 = vsel %vm1117_vm9, 1.0, %v3790_v37  ;;  %v3843_v15 = vld [vmem:[#allocation23_spill] sm:$0xff] }
 0x3a4   : > { %v1151_v49 = vsel %vm1119_vm15, 1.0, %v3790_v37  ;;  %vm1123_vm15 = vcmp.eq.f32.partialorder %v3841_v26, %v1085_v53  ;;  %v1616_v44 = vmul.f32 %v3329_v58, %v3843_v15  ;;  %v3847_v58 = vld [vmem:[#allocation26_spill] sm:$0xff] }
 0x3a8   : > { %v1313_v10 = vpop.permute.xlu2 %1312 }
 0x3a9   : > { %v1413_v33 = vmul.f32 %v1313_v10, %v3450_v8  ;;  %v1331_v30 = vpop.permute.xlu1 %1330  ;;  %v3486_v10 = vsel %vm1123_vm15, 1.0, %v3790_v37 }
 0x3aa   : > { %1493 = vperm.xlu2 %2105, %v1402_v24   ;;  %1487 = vperm.xlu1 %2103, %v1400_v6   ;;  %v1414_v24 = vmul.f32 %v1319_v7, %v1151_v49  ;;  %v3466_v6 = vsel %vm1121_vm3, 1.0, %v3790_v37  ;;  %v3842_v7 = vld [vmem:[#allocation22_spill] sm:$0xff] }
 0x3ab   : > { %1499 = vperm.xlu0 %2104, %v1404_v32   ;;  %v1412_v32 = vmul.f32 %v3365_v14, %v3461_v63  ;;  %v1416_v55 = vmul.f32 %v1331_v30, %v3466_v6  ;;  %vm1125_vm3 = vcmp.eq.f32.partialorder %v3842_v7, %v1085_v53  ;;  %v3844_v30 = vld [vmem:[#allocation24_spill] sm:$0xff] }
 0x3b0   : > { %v1325_v52 = vpop.permute.xlu2 %1324 }
 0x3b2   : > { %1502 = vperm.xlu2 %2105, %v1405_v46   ;;  %1496 = vperm.xlu1 %2103, %v1403_v11   ;;  %v3839_v46 = vld [vmem:[#allocation19_spill] sm:$0xff]  ;;  %v3840_v11 = vld [vmem:[#allocation21_spill] sm:$0xff] }
 0x3b3   : > { %1508 = vperm.xlu0 %2104, %v1407_v59   ;;  %vm1122_vm8 = vcmp.eq.f32.partialorder %v3839_v46, %v1085_v53  ;;  %vm1124_vm9 = vcmp.eq.f32.partialorder %v3840_v11, %v1085_v53  ;;  %v3475_v59 = vsel %vm1120_vm7, 1.0, %v3790_v37  ;;  %v1617_v53 = vmul.f32 %v3332_v39, %v3844_v30  ;;  %v3848_v11 = vld [vmem:[#allocation27_spill] sm:$0xff] }
 0x3b4   : > { %v1154_v22 = vsel %vm1122_vm8, 1.0, %v3790_v37  ;;  %v3479_v14 = vsel %vm1124_vm9, 1.0, %v3790_v37  ;;  %v1415_v41 = vmul.f32 %v1325_v52, %v3475_v59  ;;  %v3845_v52 = vld [vmem:[#allocation33_spill] sm:$0xff]  ;;  %v1619_v46 = vmul.f32 %v3344_v42, %v3847_v58 }
 0x3b5   : > { %v1641_v42 = vmul.f32 %v1151_v49, %v3136_v57  ;;  %v3854_v57 = vld [vmem:[#allocation32_spill] sm:$0xff] }
 0x3b6   : > { %v1625_v49 = vmul.f32 %v3363_v4, %v3854_v57  ;;  %v3863_v57 = vld [vmem:[#allocation43_spill] sm:$0xff] }
 0x3ba   : > { %1511 = vperm.xlu2 %2105, %v1408_v36   ;;  %1505 = vperm.xlu1 %2103, %v1406_v54   ;;  %v1350_v36 = vpop.permute.xlu1 %1349  ;;  %v1338_v54 = vpop.permute.xlu0 %1337 }
 0x3bb   : > { %1517 = vperm.xlu0 %2104, %v1410_v40   ;;  %v1344_v40 = vpop.permute.xlu2 %1343  ;;  %v1417_v35 = vmul.f32 %v1338_v54, %v1154_v22  ;;  %v1419_v16 = vmul.f32 %v1350_v36, %v3479_v14  ;;  %v1620_v36 = vmul.f32 %v3341_v43, %v3848_v11  ;;  %v3850_v54 = vld [vmem:[#allocation28_spill] sm:$0xff]  ;;  %v3852_v43 = vld [vmem:[#allocation30_spill] sm:$0xff] }
 0x3bc   : > { %v1623_v25 = vmul.f32 %v3357_v62, %v3852_v43  ;;  %v3860_v43 = vld [vmem:[#allocation39_spill] sm:$0xff] }
 0x3c2   : > { %1520 = vperm.xlu2 %2105, %v1411_v17   ;;  %1514 = vperm.xlu1 %2103, %v1409_v50   ;;  %v3489_v17 = vsel %vm1125_vm3, 1.0, %v3790_v37 }
 0x3c3   : > { %1526 = vperm.xlu0 %2104, %v1413_v33   ;;  %v1356_v50 = vpop.permute.xlu2 %1355  ;;  %v1418_v33 = vmul.f32 %v1344_v40, %v3486_v10  ;;  %v1621_v40 = vmul.f32 %v3360_v2, %v3850_v54 }
 0x3c4   : > { %v1420_v3 = vmul.f32 %v1356_v50, %v3489_v17 }
 0x3ca   : > { %1529 = vperm.xlu2 %2105, %v1414_v24   ;;  %1523 = vperm.xlu1 %2103, %v1412_v32   ;;  %v1626_v24 = vmul.f32 %v3375_v21, %v3845_v52  ;;  %v3846_v32 = vld [vmem:[#allocation25_spill] sm:$0xff]  ;;  %v3849_v21 = vld [vmem:[#allocation40_spill] sm:$0xff] }
 0x3cb   : > { %1535 = vperm.xlu0 %2104, %v1416_v55   ;;  %v1618_v37 = vmul.f32 %v3326_v12, %v3846_v32  ;;  %v1635_v12 = vmul.f32 %v3427_v51, %v3849_v21  ;;  %v3858_v21 = vld [vmem:[#allocation37_spill] sm:$0xff] }
 0x3d2   : > { %1532 = vperm.xlu1 %2103, %v1415_v41   ;;  %1538 = vperm.xlu2 %2105, %v1417_v35   ;;  %v3851_v41 = vld [vmem:[#allocation29_spill] sm:$0xff] }
 0x3d3   : > { %1544 = vperm.xlu0 %2104, %v1419_v16   ;;  %v1622_v35 = vmul.f32 %v3347_v38, %v3851_v41  ;;  %v3853_v16 = vld [vmem:[#allocation31_spill] sm:$0xff] }
 0x3d4   : > { %v1624_v26 = vmul.f32 %v3378_v1, %v3853_v16  ;;  %v1644_v1 = vmul.f32 %v1154_v22, %v3186_v13  ;;  %v3856_v13 = vld [vmem:[#allocation35_spill] sm:$0xff] }
 0x3d5   : > { %v1629_v22 = vmul.f32 %v3392_v19, %v3856_v13 }
 0x3da   : > { %1541 = vperm.xlu1 %2103, %v1418_v33   ;;  %1547 = vperm.xlu2 %2105, %v1420_v3   ;;  %v1627_v3 = vmul.f32 %v3395_v27, %v3079_v29 }
 0x3db   : > { %1681 = vperm.xlu0 %2104, %v1616_v44  }
 0x3e2   : > { %1711 = vperm.xlu1 %2103, %v1626_v24   ;;  %1684 = vperm.xlu2 %2105, %v1617_v53   ;;  %v3855_v24 = vld [vmem:[#allocation34_spill] sm:$0xff] }
 0x3e3   : > { %1687 = vperm.xlu0 %2104, %v1618_v37   ;;  %v1628_v32 = vmul.f32 %v3381_v9, %v3855_v24 }
 0x3e4   : > { %v1461_v55 = vpop.permute.xlu2 %1460 }
 0x3e5   : > { %v1552_v33 = vperm.slane %v1461_v55, %v3133_v18 }
 0x3ea   : > { %1735 = vperm.xlu1 %2103, %v1634_v45   ;;  %1690 = vperm.xlu2 %2105, %v1619_v46  }
 0x3eb   : > { %1693 = vperm.xlu0 %2104, %v1620_v36   ;;  %v3857_v36 = vld [vmem:[#allocation36_spill] sm:$0xff] }
 0x3ec   : > { %v1467_v39 = vpop.permute.xlu2 %1466  ;;  %v1630_v19 = vmul.f32 %v3413_v0, %v3857_v36  ;;  %v1633_v0 = vmul.f32 %v3430_v34, %v3860_v43  ;;  %v1638_v34 = vmul.f32 %v3444_v47, %v3863_v57  ;;  %v3867_v47 = vld [vmem:[#allocation48_spill] sm:$0xff] }
 0x3ed   : > { %v1556_v37 = vperm.slane %v1467_v39, %v2377_v5  ;;  %v1645_v24 = vmul.f32 %v3486_v10, %v3867_v47 }
 0x3f2   : > { %1738 = vperm.xlu1 %2103, %v1635_v12   ;;  %1696 = vperm.xlu2 %2105, %v1621_v40   ;;  %v1631_v12 = vmul.f32 %v3398_v48, %v3858_v21 }
 0x3f3   : > { %1699 = vperm.xlu0 %2104, %v1622_v35  }
 0x3f4   : > { %v1476_v56 = vpop.permute.xlu2 %1475 }
 0x3f5   : > { %v1561_v46 = vperm.slane %v1476_v56, %v3130_v60  ;;  %v3859_v56 = vld [vmem:[#allocation38_spill] sm:$0xff] }
 0x3fa   : > { %1756 = vperm.xlu1 %2103, %v1641_v42   ;;  %1702 = vperm.xlu2 %2105, %v1623_v25   ;;  %v1632_v42 = vmul.f32 %v3410_v61, %v3859_v56 }
 0x3fb   : > { %1705 = vperm.xlu0 %2104, %v1624_v26   ;;  %v3861_v26 = vld [vmem:[#allocation41_spill] sm:$0xff] }
 0x3fc   : > { %v3518_v51 = vpop.permute.xlu2 %1484  ;;  %v1455_v2 = vpop.permute.xlu1 %1454 }
 0x3fd   : > { %v1549_v38 = vperm.slane %v1455_v2, %v2377_v5  ;;  %v1458_v7 = vpop.permute.xlu0 %1457  ;;  %v1636_v2 = vmul.f32 %v3447_v23, %v3861_v26 }
 0x3fe   : > { %v1550_v50 = vperm.slane %v1458_v7, %v3120_v20 }
 0x400   : > { %v1551_v62 = vsel %vm999_vm1, %v1550_v50, %v1549_v38  ;;  %v3862_v38 = vld [vmem:[#allocation42_spill] sm:$0xff] }
 0x401   : > { %v1553_v15 = vsel %vm1003_vm5, %v1552_v33, %v1551_v62  ;;  %v1637_v7 = vmul.f32 %v3433_v31, %v3862_v38 }
 0x402   : > { %1765 = vperm.xlu1 %2103, %v1644_v1   ;;  %1708 = vperm.xlu2 %2105, %v1625_v49   ;;  %v3864_v49 = vld [vmem:[#allocation45_spill] sm:$0xff] }
 0x403   : > { %1714 = vperm.xlu0 %2104, %v1627_v3   ;;  %v1640_v62 = vmul.f32 %v3450_v8, %v3864_v49  ;;  %v3868_v8 = vld [vmem:[#allocation47_spill] sm:$0xff] }
 0x404   : > { %v3530_v44 = vpop.permute.xlu2 %1493  ;;  %v1464_v30 = vpop.permute.xlu1 %1463 }
 0x405   : > { %v1554_v53 = vperm.slane %v1464_v30, %v3130_v60  ;;  %v1473_v52 = vpop.permute.xlu0 %1472  ;;  %v3866_v30 = vld [vmem:[#allocation46_spill] sm:$0xff] }
 0x406   : > { %v1559_v58 = vperm.slane %v1473_v52, %v3133_v18  ;;  %v1642_v31 = vmul.f32 %v3475_v59, %v3866_v30 }
 0x407   : > { %v1555_v4 = vsel %vm1007_vm6, %v1554_v53, %v1553_v15  ;;  %v3865_v15 = vld [vmem:[#allocation44_spill] sm:$0xff] }
 0x408   : > { %v1639_v23 = vmul.f32 %v3461_v63, %v3865_v15 }
 0x40a   : > { %1717 = vperm.xlu2 %2105, %v1628_v32   ;;  %v1643_v32 = vmul.f32 %v3466_v6, %v3868_v8  ;;  %v1571_v6 = vperm.slane %v3530_v44, %v3120_v20 }
 0x40b   : > { %1720 = vperm.xlu0 %2104, %v1629_v22  }
 0x40c   : > { %v3538_v29 = vpop.permute.xlu2 %1502  ;;  %v1470_v27 = vpop.permute.xlu1 %1469 }
 0x40d   : > { %v1557_v55 = vperm.slane %v1470_v27, %v3120_v20  ;;  %v1482_v45 = vpop.permute.xlu0 %1481  ;;  %v3869_v27 = vld [vmem:[#allocation50_spill] sm:$0xff] }
 0x40e   : > { %v1647_v59 = vmul.f32 %v3489_v17, %v3869_v27  ;;  %v1564_v10 = vperm.slane %v1482_v45, %v3120_v20 }
 0x40f   : > { %v1558_v11 = vsel %vm999_vm1, %v1557_v55, %v1556_v37 }
 0x410   : > { %v1560_v9 = vsel %vm1003_vm5, %v1559_v58, %v1558_v11  ;;  %v1577_v11 = vperm.slane %v3538_v29, %v2377_v5 }
 0x411   : > { %v1562_v54 = vsel %vm1007_vm6, %v1561_v46, %v1560_v9 }
 0x412   : > { %1723 = vperm.xlu2 %2105, %v1630_v19   ;;  %v3552_v39 = vsel %vm1058_vm10, %v1562_v54, %v1555_v4 }
 0x413   : > { %1726 = vperm.xlu0 %2104, %v1631_v12   ;;  %v1566_v12 = vperm.slane %v3518_v51, %v3133_v18 }
 0x414   : > { %v3554_v40 = vpop.permute.xlu2 %1511  ;;  %v1479_v41 = vpop.permute.xlu1 %1478 }
 0x415   : > { %v1491_v35 = vpop.permute.xlu0 %1490  ;;  %v1563_v37 = vperm.slane %v1479_v41, %v2377_v5 }
 0x416   : > { %v1570_v55 = vperm.slane %v1491_v35, %v2377_v5 }
 0x417   : > { %v1565_v17 = vsel %vm999_vm1, %v1564_v10, %v1563_v37 }
 0x418   : > { %v1572_v45 = vsel %vm999_vm1, %v1571_v6, %v1570_v55  ;;  %v1567_v43 = vsel %vm1003_vm5, %v1566_v12, %v1565_v17 }
 0x41a   : > { %1729 = vperm.xlu2 %2105, %v1632_v42  }
 0x41b   : > { %1732 = vperm.xlu0 %2104, %v1633_v0  }
 0x41c   : > { %v1488_v48 = vpop.permute.xlu1 %1487  ;;  %v3562_v16 = vpop.permute.xlu2 %1520 }
 0x41d   : > { %v3560_v25 = vpop.permute.xlu0 %1499  ;;  %v1568_v36 = vperm.slane %v1488_v48, %v3130_v60 }
 0x41e   : > { %v1575_v51 = vperm.slane %v3560_v25, %v3130_v60 }
 0x41f   : > { %v1569_v48 = vsel %vm1007_vm6, %v1568_v36, %v1567_v43 }
 0x420   : > { %v1606_v57 = vsel %vm1060_vm2, %v1569_v48, %v3552_v39 }
 0x422   : > { %1741 = vperm.xlu2 %2105, %v1636_v2  }
 0x423   : > { %1744 = vperm.xlu0 %2104, %v1637_v7   ;;  %v1582_v7 = vperm.slane %v3554_v40, %v3130_v60 }
 0x424   : > { %v1497_v50 = vpop.permute.xlu1 %1496  ;;  %v1530_v33 = vpop.permute.xlu2 %1529 }
 0x425   : > { %v1509_v61 = vpop.permute.xlu0 %1508  ;;  %v1573_v46 = vperm.slane %v1497_v50, %v3133_v18  ;;  %v1592_v0 = vperm.slane %v1530_v33, %v3120_v20  ;;  %v1587_v50 = vperm.slane %v3562_v16, %v3133_v18 }
 0x426   : > { %v1580_v35 = vperm.slane %v1509_v61, %v3133_v18 }
 0x427   : > { %v1574_v29 = vsel %vm1003_vm5, %v1573_v46, %v1572_v45 }
 0x428   : > { %v1576_v61 = vsel %vm1007_vm6, %v1575_v51, %v1574_v29  ;;  %v3870_v29 = vld [vmem:[#allocation49_spill] sm:$0xff] }
 0x429   : > { %v1607_v40 = vsel %vm1062_vm4, %v1576_v61, %v1606_v57 }
 0x42a   : > { %1747 = vperm.xlu2 %2105, %v1638_v34  }
 0x42b   : > { %1753 = vperm.xlu0 %2104, %v1640_v62  }
 0x42c   : > { %v1506_v1 = vpop.permute.xlu1 %1505  ;;  %v3576_v53 = vpop.permute.xlu2 %1538 }
 0x42d   : > { %v1518_v3 = vpop.permute.xlu0 %1517  ;;  %v1578_v58 = vperm.slane %v1506_v1, %v3120_v20  ;;  %v1598_v16 = vperm.slane %v3576_v53, %v2377_v5 }
 0x42e   : > { %v1585_v56 = vperm.slane %v1518_v3, %v3120_v20 }
 0x42f   : > { %v1579_v54 = vsel %vm999_vm1, %v1578_v58, %v1577_v11 }
 0x430   : > { %v1581_v26 = vsel %vm1003_vm5, %v1580_v35, %v1579_v54  ;;  %v1646_v35 = vmul.f32 %v3479_v14, %v3870_v29 }
 0x431   : > { %v1583_v34 = vsel %vm1007_vm6, %v1582_v7, %v1581_v26 }
 0x432   : > { %1750 = vperm.xlu2 %2105, %v1639_v23  }
 0x433   : > { %1759 = vperm.xlu0 %2104, %v1642_v31  }
 0x434   : > { %v1515_v52 = vpop.permute.xlu1 %1514  ;;  %v1548_v13 = vpop.permute.xlu2 %1547 }
 0x435   : > { %v1527_v4 = vpop.permute.xlu0 %1526  ;;  %v1584_v19 = vperm.slane %v1515_v52, %v2377_v5 }
 0x436   : > { %v1591_v44 = vperm.slane %v1527_v4, %v2377_v5  ;;  %v1603_v4 = vperm.slane %v1548_v13, %v3130_v60 }
 0x437   : > { %v1586_v2 = vsel %vm999_vm1, %v1585_v56, %v1584_v19 }
 0x438   : > { %v1593_v25 = vsel %vm999_vm1, %v1592_v0, %v1591_v44  ;;  %v1588_v49 = vsel %vm1003_vm5, %v1587_v50, %v1586_v2 }
 0x43a   : > { %1768 = vperm.xlu2 %2105, %v1645_v24   ;;  %v1608_v24 = vsel %vm1064_vm11, %v1583_v34, %v1607_v40 }
 0x43b   : > { %1762 = vperm.xlu0 %2104, %v1643_v32  }
 0x43c   : > { %v1524_v22 = vpop.permute.xlu1 %1523  ;;  %v1685_v41 = vpop.permute.xlu2 %1684 }
 0x43d   : > { %v1536_v63 = vpop.permute.xlu0 %1535  ;;  %v1589_v38 = vperm.slane %v1524_v22, %v3130_v60  ;;  %v1777_v30 = vperm.slane %v1685_v41, %v3120_v20 }
 0x43e   : > { %v1596_v62 = vperm.slane %v1536_v63, %v3130_v60 }
 0x43f   : > { %v1590_v3 = vsel %vm1007_vm6, %v1589_v38, %v1588_v49 }
 0x440   : > { %v1609_v22 = vsel %vm1066_vm12, %v1590_v3, %v1608_v24 }
 0x442   : > { %1774 = vperm.xlu2 %2105, %v1647_v59  }
 0x444   : > { %v1533_v9 = vpop.permute.xlu1 %1532  ;;  %v1691_v53 = vpop.permute.xlu2 %1690 }
 0x445   : > { %v1545_v21 = vpop.permute.xlu0 %1544  ;;  %v1594_v42 = vperm.slane %v1533_v9, %v3133_v18  ;;  %v1781_v58 = vperm.slane %v1691_v53, %v3130_v60 }
 0x446   : > { %v1601_v39 = vperm.slane %v1545_v21, %v3133_v18 }
 0x447   : > { %v1595_v33 = vsel %vm1003_vm5, %v1594_v42, %v1593_v25 }
 0x448   : > { %v1597_v52 = vsel %vm1007_vm6, %v1596_v62, %v1595_v33 }
 0x449   : > { %v1610_v27 = vsel %vm1068_vm13, %v1597_v52, %v1609_v22 }
 0x44c   : > { %v1542_v1 = vpop.permute.xlu1 %1541  ;;  %v1697_v6 = vpop.permute.xlu2 %1696 }
 0x44d   : > { %v1599_v15 = vperm.slane %v1542_v1, %v3120_v20  ;;  %v1682_v23 = vpop.permute.xlu0 %1681  ;;  %v1784_v9 = vperm.slane %v1697_v6, %v3120_v20 }
 0x44e   : > { %v1776_v31 = vperm.slane %v1682_v23, %v2377_v5 }
 0x44f   : > { %v1600_v47 = vsel %vm999_vm1, %v1599_v15, %v1598_v16 }
 0x450   : > { %v1778_v8 = vsel %vm999_vm1, %v1777_v30, %v1776_v31  ;;  %v1602_v32 = vsel %vm1003_vm5, %v1601_v39, %v1600_v47 }
 0x451   : > { %v1604_v63 = vsel %vm1007_vm6, %v1603_v4, %v1602_v32 }
 0x452   : > { %v1611_v59 = vsel %vm1070_vm14, %v1604_v63, %v1610_v27 }
 0x453   : > { %v1613_v37 = vsel %vm183_vm0, %v1611_v59, 0.0 }
 0x454   : > { %1614 = vadd.xlane.f32.xlu1 %v1613_v37  ;;  %v1703_v19 = vpop.permute.xlu2 %1702  ;;  %v1712_v26 = vpop.permute.xlu1 %1711 }
 0x455   : > { %v1688_v13 = vpop.permute.xlu0 %1687  ;;  %v1788_v45 = vperm.slane %v1703_v19, %v3130_v60  ;;  %v1793_v47 = vperm.slane %v1712_v26, %v3133_v18 }
 0x456   : > { %v1779_v55 = vperm.slane %v1688_v13, %v3133_v18 }
 0x458   : > { %v1780_v10 = vsel %vm1003_vm5, %v1779_v55, %v1778_v8 }
 0x459   : > { %v1782_v46 = vsel %vm1007_vm6, %v1781_v58, %v1780_v10 }
 0x45c   : > { %v1709_v42 = vpop.permute.xlu2 %1708  ;;  %v1736_v7 = vpop.permute.xlu1 %1735 }
 0x45d   : > { %v1694_v11 = vpop.permute.xlu0 %1693  ;;  %v1791_v30 = vperm.slane %v1709_v42, %v3120_v20  ;;  %v1807_v32 = vperm.slane %v1736_v7, %v3133_v18 }
 0x45e   : > { %v1783_v17 = vperm.slane %v1694_v11, %v2377_v5 }
 0x460   : > { %v1785_v36 = vsel %vm999_vm1, %v1784_v9, %v1783_v17 }
 0x464   : > { %v1718_v51 = vpop.permute.xlu2 %1717  ;;  %v1739_v25 = vpop.permute.xlu1 %1738 }
 0x465   : > { %v1700_v21 = vpop.permute.xlu0 %1699  ;;  %v1797_v31 = vperm.slane %v1718_v51, %v2377_v5  ;;  %v1809_v37 = vperm.slane %v1739_v25, %v3130_v60 }
 0x466   : > { %v1786_v12 = vperm.slane %v1700_v21, %v3133_v18 }
 0x468   : > { %v1787_v54 = vsel %vm1003_vm5, %v1786_v12, %v1785_v36 }
 0x469   : > { %v1789_v44 = vsel %vm1007_vm6, %v1788_v45, %v1787_v54 }
 0x46a   : > { %v1832_v41 = vsel %vm1058_vm10, %v1789_v44, %v1782_v46 }
 0x46c   : > { %v1724_v48 = vpop.permute.xlu2 %1723  ;;  %v1757_v34 = vpop.permute.xlu1 %1756 }
 0x46d   : > { %1771 = vperm.xlu1 %2103, %v1646_v35   ;;  %v1706_v56 = vpop.permute.xlu0 %1705  ;;  %v1800_v13 = vperm.slane %v1724_v48, %v3133_v18  ;;  %v1819_v10 = vperm.slane %v1757_v34, %v3120_v20 }
 0x46e   : > { %v1790_v40 = vperm.slane %v1706_v56, %v2377_v5 }
 0x470   : > { %v1792_v24 = vsel %vm999_vm1, %v1791_v30, %v1790_v40 }
 0x471   : > { %v1794_v46 = vsel %vm1003_vm5, %v1793_v47, %v1792_v24 }
 0x474   : > { %v1730_v38 = vpop.permute.xlu2 %1729  ;;  %v1766_v14 = vpop.permute.xlu1 %1765 }
 0x475   : > { %v1715_v43 = vpop.permute.xlu0 %1714  ;;  %v1804_v39 = vperm.slane %v1730_v38, %v2377_v5  ;;  %v1825_v35 = vperm.slane %v1766_v14, %v2377_v5  ;;  %v1855_v14 = vand.u32 2147483647, %v3316_v28 }
 0x476   : > { %v1795_v53 = vperm.slane %v1715_v43, %v3130_v60 }
 0x477   : > { %vm1856_vm10 = vcmp.eq.f32.partialorder %v1855_v14, 8.507059e+37 }
 0x478   : > { %v1796_v9 = vsel %vm1007_vm6, %v1795_v53, %v1794_v46 }
 0x479   : > { %v1833_v56 = vsel %vm1060_vm2, %v1796_v9, %v1832_v41 }
 0x47c   : > { %v1742_v61 = vpop.permute.xlu2 %1741 }
 0x47d   : > { %v1721_v0 = vpop.permute.xlu0 %1720  ;;  %v1811_v52 = vperm.slane %v1742_v61, %v2377_v5 }
 0x47e   : > { %v1798_v15 = vperm.slane %v1721_v0, %v3120_v20 }
 0x480   : > { %v1799_v22 = vsel %vm999_vm1, %v1798_v15, %v1797_v31 }
 0x481   : > { %v1801_v17 = vsel %vm1003_vm5, %v1800_v13, %v1799_v22 }
 0x484   : > { %v1748_v57 = vpop.permute.xlu2 %1747 }
 0x485   : > { %v1727_v2 = vpop.permute.xlu0 %1726  ;;  %v1814_v55 = vperm.slane %v1748_v57, %v3133_v18 }
 0x486   : > { %v1802_v63 = vperm.slane %v1727_v2, %v3130_v60 }
 0x488   : > { %v1803_v21 = vsel %vm1007_vm6, %v1802_v63, %v1801_v17 }
 0x489   : > { %v1834_v0 = vsel %vm1062_vm4, %v1803_v21, %v1833_v56 }
 0x48c   : > { %v1751_v62 = vpop.permute.xlu2 %1750 }
 0x48d   : > { %v1733_v50 = vpop.permute.xlu0 %1732  ;;  %v1816_v12 = vperm.slane %v1751_v62, %v3130_v60  ;;  %v1857_v62 = vand.u32 2147483648, %v3316_v28 }
 0x48e   : > { %v1805_v16 = vperm.slane %v1733_v50, %v3120_v20 }
 0x490   : > { %v1806_v8 = vsel %vm999_vm1, %v1805_v16, %v1804_v39  ;;  %v1858_v16 = vor.u32 1.1754944e-38, %v1857_v62 }
 0x491   : > { %v1808_v6 = vsel %vm1003_vm5, %v1807_v32, %v1806_v8 }
 0x492   : > { %v1810_v54 = vsel %vm1007_vm6, %v1809_v37, %v1808_v6 }
 0x493   : > { %v1835_v38 = vsel %vm1064_vm11, %v1810_v54, %v1834_v0 }
 0x494   : > { %v1769_v3 = vpop.permute.xlu2 %1768 }
 0x495   : > { %v1745_v33 = vpop.permute.xlu0 %1744  ;;  %v1826_v45 = vperm.slane %v1769_v3, %v3120_v20 }
 0x496   : > { %v1812_v23 = vperm.slane %v1745_v33, %v3120_v20 }
 0x497   : > { %v1827_v26 = vsel %vm999_vm1, %v1826_v45, %v1825_v35 }
 0x498   : > { %v1813_v27 = vsel %vm999_vm1, %v1812_v23, %v1811_v52 }
 0x499   : > { %v1815_v36 = vsel %vm1003_vm5, %v1814_v55, %v1813_v27 }
 0x49a   : > { %v1817_v51 = vsel %vm1007_vm6, %v1816_v12, %v1815_v36 }
 0x49b   : > { %v1836_v41 = vsel %vm1066_vm12, %v1817_v51, %v1835_v38 }
 0x49c   : > { %v1775_v44 = vpop.permute.xlu2 %1774 }
 0x49d   : > { %v1754_v49 = vpop.permute.xlu0 %1753  ;;  %v1830_v2 = vperm.slane %v1775_v44, %v3130_v60 }
 0x49e   : > { %v1818_v58 = vperm.slane %v1754_v49, %v2377_v5 }
 0x4a0   : > { %v1820_v29 = vsel %vm999_vm1, %v1819_v10, %v1818_v58 }
 0x4a5   : > { %v1760_v1 = vpop.permute.xlu0 %1759 }
 0x4a6   : > { %v1821_v11 = vperm.slane %v1760_v1, %v3133_v18 }
 0x4a8   : > { %v1822_v42 = vsel %vm1003_vm5, %v1821_v11, %v1820_v29 }
 0x4ad   : > { %v1763_v59 = vpop.permute.xlu0 %1762 }
 0x4ae   : > { %v1823_v19 = vperm.slane %v1763_v59, %v3130_v60 }
 0x4b0   : > { %v1824_v48 = vsel %vm1007_vm6, %v1823_v19, %v1822_v42 }
 0x4b1   : > { %v1837_v50 = vsel %vm1068_vm13, %v1824_v48, %v1836_v41 }
 0x4c7   : > { %v1615_v4 = vpop.xlane.xlu1 %1614 }
 0x4c8   : > { %v1843_v34 = vmul.f32 %v1615_v4, %v3316_v28 }
 0x4ca   : > { %v1844_v1 = vadd.f32 1.0, %v1843_v34 }
 0x4df   : > { %v1772_v43 = vpop.permute.xlu1 %1771 }
 0x4e0   : > { %v1828_v20 = vperm.slane %v1772_v43, %v3133_v18  ;;  %v2107_v18 = vpop.eup %2106 }
 0x4e1   : > { %v1847_v60 = vmul.f32 %v2107_v18, %v3316_v28  ;;  %vm1852_vm1 = vweird.f32 %v2107_v18 }
 0x4e2   : > { %v1829_v5 = vsel %vm1003_vm5, %v1828_v20, %v1827_v26  ;;  %vm1851_vm5 = vweird.f32 %v3316_v28  ;;  %v3871_v28 = vld [vmem:[#allocation11_spill] sm:$0xff] }
 0x4e3   : > { %v1831_v7 = vsel %vm1007_vm6, %v1830_v2, %v1829_v5  ;;  %v1848_v33 = vsub.f32 1.0, %v1847_v60  ;;  %vm1853_vm6 = vmor %vm1851_vm5, %vm1852_vm1 }
 0x4e4   : > { %v1838_v61 = vsel %vm1070_vm14, %v1831_v7, %v1837_v50 }
 0x4e5   : > { %v1840_v25 = vsel %vm183_vm0, %v1838_v61, 0.0  ;;  %v1849_v57 = vmul.f32 %v2107_v18, %v1848_v33 }
 0x4e6   : > { %1841 = vadd.xlane.f32.xlu0 %v1840_v25 }
 0x4e7   : > { %v1850_v49 = vadd.f32 %v2107_v18, %v1849_v57 }
 0x4e9   : > { %v1854_v40 = vsel %vm1853_vm6, %v2107_v18, %v1850_v49 }
 0x4ea   : > { %v1859_v23 = vsel %vm1856_vm10, %v1858_v16, %v1854_v40 }
 0x559   : > { %v1842_v3 = vpop.xlane.xlu0 %1841 }
 0x55a   : > { %v1845_v15 = vsub.f32 %v1844_v1, %v1842_v3 }
 0x55c   : > { %v1860_v30 = vmul.f32 %v1859_v23, %v1845_v15 }
 0x55e   : > { %v1861_v39 = vsub.f32 %v3871_v28, %v1860_v30 }
 0x560   : > { %v1862_v31 = vmax.f32 %v1861_v39, 0.0 }
 0x562   : > { %1863 = vst.msk [vmem:[%s177_s13] sm:$0xff] %vm183_vm0, %v1862_v31 }
 0x563   : > { %2195 = shalt.err (!%p2192_p9)
}
 0x564   : > { %1985 = dma.vmem_to_hbm [thread:$0]  (%p2320_p13), %s1878_s14, 128, %s1880_s15, %s1865_s16  }
 0x565 PF: > { %s1891_s3 = sand.u32 1, %s2226_s9   ;;  %p3872_p10 = scmp.ge.s32.totalorder %s2238_s12, 2 }
 0x566   : > { %s1892_s29 = scalar_lea.sflag [#allocation4], %s1891_s3 }
 0x567   : > { %p1996_p11 = pnand %p3872_p10, %p2325_p4 }
 0x569   : > { %p1997_p0 = pneg %p1996_p11 }
 0x56b   : > { %2221 = dma.done.wait (%p1997_p0), %s1892_s29, 128  }
 0x56c   : > { %2223 = vsyncadd (%p1997_p0), %s1892_s29, 4294967168  ;;  %p16_p2 = scmp.ge.s32.totalorder %s2300_s23, 4   ;;  %s3873_s9 = smov %s2230_s10 }
 0x56d   : > { %s3874_s10 = smov %s2234_s11  ;;  %s3875_s11 = smov %s2312_s26 }
 0x56e   : > { %s3876_s12 = smov %s2300_s23  ;;  %18 = sbr.rel (!%p16_p2) target bundleno = 6 (0x6), region = 77 }
 0x573   :  { %1898 = vsyncpa [#allocation3], 1 }
 0x574   :  { %1900 = vsyncpa [#allocation3 + $0x1], 1 }
 0x575   :  { %1901 = vsyncpa [#allocation6], 1 }
 0x576   :  { %1902 = vsyncpa [#allocation4], 1 }
 0x577   :  { %1904 = vsyncpa [#allocation4 + $0x1], 1 }

</bundles_post_ra>
